<compile_context>
chip_gen: v6e
topology: v6e:2x2x1
jax: 0.10.0
libtpu: 0.0.40
codegen_flags: <defaults>
</compile_context>

<pallas_src>
import functools

import jax
import jax.numpy as jnp
from jax.experimental import pallas as pl
from jax.experimental.pallas import tpu as pltpu


def _round_up(x, m):
    return (x + m - 1) // m * m


# ---------------------------------------------------------------------------
# Kernel
# ---------------------------------------------------------------------------
def mutan_fusion_kernel(v_ref, q_ref,
                        wv_ref, bv_ref, wq_ref, bq_ref,
                        whv_ref, bhv_ref, whq_ref, bhq_ref,
                        o_ref, *, R, dmm_p, tanh_dtype):
    cdt = whv_ref.dtype  # MXU compute dtype (bf16 fast path / f32 check path)

    # --- v / q embeddings (once per batch tile) ------------------------------
    xv_pre = jnp.dot(v_ref[...], wv_ref[...],
                     preferred_element_type=jnp.float32) + bv_ref[...]
    xq_pre = jnp.dot(q_ref[...], wq_ref[...],
                     preferred_element_type=jnp.float32) + bq_ref[...]
    # tanh in `tanh_dtype`: bf16 on v6e/v7x roughly doubles EUP throughput;
    # use f32 on v5e (no bf16 EUP) or for strict correctness checks.
    xv = jnp.tanh(xv_pre.astype(tanh_dtype)).astype(cdt)
    xq = jnp.tanh(xq_pre.astype(tanh_dtype)).astype(cdt)

    # --- all R rank projections in ONE wide matmul per side ------------------
    hv = jnp.tanh((jnp.dot(xv, whv_ref[...], preferred_element_type=jnp.float32)
                   + bhv_ref[...]).astype(tanh_dtype))
    hq = jnp.tanh((jnp.dot(xq, whq_ref[...], preferred_element_type=jnp.float32)
                   + bhq_ref[...]).astype(tanh_dtype))

    # --- fused multiply-accumulate over ranks --------------------------------
    # No full (tb, R*dmm_p) product intermediate; slices are 128-lane aligned.
    acc = (hv[:, 0:dmm_p] * hq[:, 0:dmm_p]).astype(jnp.float32)
    for r in range(1, R):
        lo = r * dmm_p
        acc = acc + (hv[:, lo:lo + dmm_p] * hq[:, lo:lo + dmm_p]).astype(jnp.float32)

    o_ref[...] = jnp.tanh(acc)  # activation_mm, f32 output


# ---------------------------------------------------------------------------
# One-time weight preprocessing (hoisted out of the forward path)
# ---------------------------------------------------------------------------
def prepare_fused_params(params, opt, compute_dtype=jnp.bfloat16):
    """Pad, rank-fuse and cast the MutanFusion weights once (not per call)."""
    wv, bv, wq, bq, whv, bhv, whq, bhq = params
    R = opt['R']
    dim_v, dim_q = opt['dim_v'], opt['dim_q']
    dim_hv, dim_hq = opt['dim_hv'], opt['dim_hq']
    dim_mm = opt['dim_mm']

    dv_p = _round_up(dim_v, 128)
    dq_p = _round_up(dim_q, 128)
    dhv_p = _round_up(dim_hv, 128)
    dhq_p = _round_up(dim_hq, 128)
    dmm_p = _round_up(dim_mm, 128)

    def pad2(x, r, c, dt):
        return jnp.pad(x, ((0, r - x.shape[0]), (0, c - x.shape[1]))).astype(dt)

    # Zero-padding is semantically inert: padded weight rows/cols and bias
    # cols are zero, so padded activation columns are tanh(0)=0 and contribute
    # nothing; padded output columns are sliced off by the caller.
    wv_p = pad2(wv, dv_p, dhv_p, compute_dtype)
    wq_p = pad2(wq, dq_p, dhq_p, compute_dtype)
    bv_p = pad2(bv, 1, dhv_p, jnp.float32)
    bq_p = pad2(bq, 1, dhq_p, jnp.float32)

    # (R, dim_h, dim_mm) -> (dim_h_p, R*dim_mm_p): one wide MXU matmul per side.
    whv_pad = jnp.pad(whv, ((0, 0), (0, dhv_p - dim_hv), (0, dmm_p - dim_mm)))
    whv2d = jnp.transpose(whv_pad, (1, 0, 2)).reshape(dhv_p, R * dmm_p)
    whv2d = whv2d.astype(compute_dtype)
    whq_pad = jnp.pad(whq, ((0, 0), (0, dhq_p - dim_hq), (0, dmm_p - dim_mm)))
    whq2d = jnp.transpose(whq_pad, (1, 0, 2)).reshape(dhq_p, R * dmm_p)
    whq2d = whq2d.astype(compute_dtype)

    # Rank biases fused into single rows (no per-rank tiny DMAs).
    bhv2d = jnp.pad(bhv, ((0, 0), (0, 0), (0, dmm_p - dim_mm)))
    bhv2d = bhv2d.reshape(1, R * dmm_p).astype(jnp.float32)
    bhq2d = jnp.pad(bhq, ((0, 0), (0, 0), (0, dmm_p - dim_mm)))
    bhq2d = bhq2d.reshape(1, R * dmm_p).astype(jnp.float32)

    return dict(
        wv=wv_p, bv=bv_p, wq=wq_p, bq=bq_p,
        whv2d=whv2d, bhv2d=bhv2d, whq2d=whq2d, bhq2d=bhq2d,
        R=R, dim_mm=dim_mm,
        dv_p=dv_p, dq_p=dq_p, dhv_p=dhv_p, dhq_p=dhq_p, dmm_p=dmm_p,
        compute_dtype=compute_dtype,
    )


def _estimate_vmem_bytes(tb, f, weight_bufs):
    """Rough VMEM footprint (bytes) for one kernel instance."""
    cbytes = jnp.dtype(f['compute_dtype']).itemsize
    R, dmm_p = f['R'], f['dmm_p']
    dv_p, dq_p, dhv_p, dhq_p = f['dv_p'], f['dq_p'], f['dhv_p'], f['dhq_p']
    act_in = 2 * tb * (dv_p + dq_p) * cbytes          # double-buffered inputs
    act_out = 2 * tb * dmm_p * 4                      # double-buffered output
    weights = weight_bufs * (
        (dv_p * dhv_p + dq_p * dhq_p + (dhv_p + dhq_p) * R * dmm_p) * cbytes
        + (dhv_p + dhq_p + 2 * R * dmm_p) * 4)
    inter = (tb * (dhv_p + dhq_p) * (4 + cbytes)      # xv/xq pre-act + cast
             + 2 * tb * R * dmm_p * 4                 # hv / hq
             + tb * dmm_p * 4)                        # accumulator
    return act_in + act_out + weights + inter * 3 // 2


# ---------------------------------------------------------------------------
# Forward
# ---------------------------------------------------------------------------
def mutan_fusion_fused(input_v, input_q, fused, *, tile_b=512, tanh_dtype=None):
    """Pallas MutanFusion forward (eval mode) using pre-fused weights.

    tile_b: batch tile; sweep 256 (v7x) / 512 (v5e, v6e).
    """
    cdt = fused['compute_dtype']
    if tanh_dtype is None:
        tanh_dtype = cdt  # bf16 tanh on v6e/v7x; pass jnp.float32 on v5e

    B = input_v.shape[0]
    R, dim_mm, dmm_p = fused['R'], fused['dim_mm'], fused['dmm_p']
    dv_p, dq_p = fused['dv_p'], fused['dq_p']
    dhv_p, dhq_p = fused['dhv_p'], fused['dhq_p']

    # Batch tiling: multiple of 16 (bf16 sublane packing). If the batch is
    # large enough, force >= 2 grid steps so both v7x TensorCores get work.
    b_p = _round_up(B, 16)
    tb = max(16, min(_round_up(tile_b, 16), b_p))
    b_p = _round_up(b_p, tb)
    if b_p // tb < 2 and b_p >= 256:
        tb = _round_up(b_p // 2, 16)
        b_p = _round_up(_round_up(B, 16), tb)

    def pad2(x, r, c, dt):
        return jnp.pad(x, ((0, r - x.shape[0]), (0, c - x.shape[1]))).astype(dt)

    v_p = pad2(input_v, b_p, dv_p, cdt)
    q_p = pad2(input_q, b_p, dq_p, cdt)

    # VMEM budget: actual footprint + margin, capped at 75% of physical
    # per-core VMEM (64 MiB on v7x, 128 MiB on v5e/v6e).
    try:
        phys_vmem = int(pltpu.get_tpu_info().vmem_capacity_bytes)
    except Exception:
        phys_vmem = 64 * 1024 * 1024  # conservative (v7x) fallback
    cap = phys_vmem * 3 // 4

    kernel = functools.partial(mutan_fusion_kernel, R=R, dmm_p=dmm_p,
                               tanh_dtype=tanh_dtype)

    def build(single_buffer_weights):
        weight_bufs = 1 if single_buffer_weights else 2
        need = _estimate_vmem_bytes(tb, fused, weight_bufs=weight_bufs)
        vmem_limit = int(min(cap, max(need + (8 << 20), 32 << 20)))
        if single_buffer_weights:
            # Grid-invariant weights: no pointless double-buffering -> this is
            # the VMEM headroom that lets tb stay large (critical on v7x).
            inv = lambda shp: pl.BlockSpec(shp, lambda i: (0, 0),
                                           pipeline_mode=pl.Buffered(1))
        else:
            inv = lambda shp: pl.BlockSpec(shp, lambda i: (0, 0))
        return pl.pallas_call(
            kernel,
            out_shape=jax.ShapeDtypeStruct((b_p, dmm_p), jnp.float32),
            grid=(b_p // tb,),
            in_specs=[
                pl.BlockSpec((tb, dv_p), lambda i: (i, 0)),   # input_v tile
                pl.BlockSpec((tb, dq_p), lambda i: (i, 0)),   # input_q tile
                inv((dv_p, dhv_p)),                           # W_v
                inv((1, dhv_p)),                              # b_v
                inv((dq_p, dhq_p)),                           # W_q
                inv((1, dhq_p)),                              # b_q
                inv((dhv_p, R * dmm_p)),                      # W_hv (fused ranks)
                inv((1, R * dmm_p)),                          # b_hv (fused ranks)
                inv((dhq_p, R * dmm_p)),                      # W_hq
                inv((1, R * dmm_p)),                          # b_hq
            ],
            out_specs=pl.BlockSpec((tb, dmm_p), lambda i: (i, 0)),
            compiler_params=pltpu.CompilerParams(
                dimension_semantics=("parallel",),
                vmem_limit_bytes=vmem_limit,
            ),
        )

    args = (v_p, q_p, fused['wv'], fused['bv'], fused['wq'], fused['bq'],
            fused['whv2d'], fused['bhv2d'], fused['whq2d'], fused['bhq2d'])
    try:
        out_p = build(True)(*args)
    except Exception:
        # Fallback: default (double-buffered) invariant specs if Buffered(1)
        # is rejected by this jax/jaxlib build. Results are identical.
        out_p = build(False)(*args)

    return out_p[:B, :dim_mm]


def mutan_fusion(input_v, input_q, params, opt, *,
                 compute_dtype=jnp.bfloat16, tile_b=512, tanh_dtype=None):
    """Convenience wrapper: prepare + forward. Prefer calling
    prepare_fused_params() once and mutan_fusion_fused() per step."""
    fused = prepare_fused_params(params, opt, compute_dtype=compute_dtype)
    return mutan_fusion_fused(input_v, input_q, fused, tile_b=tile_b,
                              tanh_dtype=tanh_dtype)


# ---------------------------------------------------------------------------
# Parameters / reference
# ---------------------------------------------------------------------------
def init_params(key, opt):
    """Deterministic synthetic parameters. Weights stored as [in, out]."""
    ks = jax.random.split(key, 8)
    s = 0.1
    wv = s * jax.random.normal(ks[0], (opt['dim_v'], opt['dim_hv']), jnp.float32)
    bv = s * jax.random.normal(ks[1], (1, opt['dim_hv']), jnp.float32)
    wq = s * jax.random.normal(ks[2], (opt['dim_q'], opt['dim_hq']), jnp.float32)
    bq = s * jax.random.normal(ks[3], (1, opt['dim_hq']), jnp.float32)
    whv = s * jax.random.normal(ks[4], (opt['R'], opt['dim_hv'], opt['dim_mm']), jnp.float32)
    bhv = s * jax.random.normal(ks[5], (opt['R'], 1, opt['dim_mm']), jnp.float32)
    whq = s * jax.random.normal(ks[6], (opt['R'], opt['dim_hq'], opt['dim_mm']), jnp.float32)
    bhq = s * jax.random.normal(ks[7], (opt['R'], 1, opt['dim_mm']), jnp.float32)
    return (wv, bv, wq, bq, whv, bhv, whq, bhq)


def mutan_fusion_ref(input_v, input_q, params, opt):
    """Pure-JAX f32 reference mirroring the PyTorch forward (eval mode)."""
    (wv, bv, wq, bq, whv, bhv, whq, bhq) = params
    x_v = jnp.tanh(input_v @ wv + bv)
    x_q = jnp.tanh(input_q @ wq + bq)
    acc = jnp.zeros((input_v.shape[0], opt['dim_mm']), jnp.float32)
    for i in range(opt['R']):
        x_hv = jnp.tanh(x_v @ whv[i] + bhv[i])
        x_hq = jnp.tanh(x_q @ whq[i] + bhq[i])
        acc = acc + x_hq * x_hv
    return jnp.tanh(acc)


if __name__ == "__main__":
    opt = {
        'dim_v': 32, 'dim_q': 32,
        'dim_hv': 32, 'dim_hq': 32,
        'dim_mm': 32, 'R': 3,
        'dropout_v': 0.5, 'dropout_q': 0.5,
        'dropout_hv': 0.0, 'dropout_hq': 0.0,
        'activation_v': 'tanh', 'activation_q': 'tanh',
        'activation_hv': 'tanh', 'activation_hq': 'tanh',
        'activation_mm': 'tanh',
    }
    B = 2

    key = jax.random.PRNGKey(0)
    k_v, k_q, k_p = jax.random.split(key, 3)
    input_v = jax.random.normal(k_v, (B, opt['dim_v']), jnp.float32)
    input_q = jax.random.normal(k_q, (B, opt['dim_q']), jnp.float32)
    params = init_params(k_p, opt)

    ref = mutan_fusion_ref(input_v, input_q, params, opt)

    # Strict correctness check: f32 compute + f32 tanh path.
    fused_f32 = prepare_fused_params(params, opt, compute_dtype=jnp.float32)
    out_f32 = jax.block_until_ready(
        mutan_fusion_fused(input_v, input_q, fused_f32))
    assert out_f32.shape == (B, opt['dim_mm'])
    assert jnp.allclose(out_f32, ref, atol=1e-5, rtol=1e-5)

    # Fast path: bf16 MXU + bf16 tanh (f32 accumulation); looser tolerance.
    fused_bf16 = prepare_fused_params(params, opt, compute_dtype=jnp.bfloat16)
    out_bf16 = jax.block_until_ready(
        mutan_fusion_fused(input_v, input_q, fused_bf16))
    assert out_bf16.shape == (B, opt['dim_mm'])
    assert jnp.allclose(out_bf16, ref, atol=5e-2, rtol=0)

    print("KERNEL_OK")
</pallas_src>

<mosaic_0001>
module attributes {stable_mosaic.version = 11 : i64} {
  func.func @mutan_fusion_kernel(%arg0: i32, %arg1: memref<16x128xf32, #tpu.memory_space<vmem>>, %arg2: memref<16x128xf32, #tpu.memory_space<vmem>>, %arg3: memref<128x128xf32, #tpu.memory_space<vmem>>, %arg4: memref<1x128xf32, #tpu.memory_space<vmem>>, %arg5: memref<128x128xf32, #tpu.memory_space<vmem>>, %arg6: memref<1x128xf32, #tpu.memory_space<vmem>>, %arg7: memref<128x384xf32, #tpu.memory_space<vmem>>, %arg8: memref<1x384xf32, #tpu.memory_space<vmem>>, %arg9: memref<128x384xf32, #tpu.memory_space<vmem>>, %arg10: memref<1x384xf32, #tpu.memory_space<vmem>>, %arg11: memref<16x128xf32, #tpu.memory_space<vmem>>) attributes {dimension_semantics = [#tpu.dimension_semantics<parallel>], iteration_bounds = array<i64: 1>, scalar_prefetch = 0 : i64, scratch_operands = 0 : i64, tpu.core_type = #tpu.core_type<tc>, window_params = [{transform_indices = @transform_0, window_bounds = array<i64: 16, 128>}, {transform_indices = @transform_1, window_bounds = array<i64: 16, 128>}, {pipeline_mode = #tpu.pipeline_mode<synchronous>, transform_indices = @transform_2, window_bounds = array<i64: 128, 128>}, {pipeline_mode = #tpu.pipeline_mode<synchronous>, transform_indices = @transform_3, window_bounds = array<i64: 1, 128>}, {pipeline_mode = #tpu.pipeline_mode<synchronous>, transform_indices = @transform_4, window_bounds = array<i64: 128, 128>}, {pipeline_mode = #tpu.pipeline_mode<synchronous>, transform_indices = @transform_5, window_bounds = array<i64: 1, 128>}, {pipeline_mode = #tpu.pipeline_mode<synchronous>, transform_indices = @transform_6, window_bounds = array<i64: 128, 384>}, {pipeline_mode = #tpu.pipeline_mode<synchronous>, transform_indices = @transform_7, window_bounds = array<i64: 1, 384>}, {pipeline_mode = #tpu.pipeline_mode<synchronous>, transform_indices = @transform_8, window_bounds = array<i64: 128, 384>}, {pipeline_mode = #tpu.pipeline_mode<synchronous>, transform_indices = @transform_9, window_bounds = array<i64: 1, 384>}, {transform_indices = @transform_10, window_bounds = array<i64: 16, 128>}]} {
    %c0 = arith.constant 0 : index
    %c0_0 = arith.constant 0 : index
    %0 = vector.load %arg1[%c0, %c0_0] : memref<16x128xf32, #tpu.memory_space<vmem>>, vector<16x128xf32>
    %c0_1 = arith.constant 0 : index
    %c0_2 = arith.constant 0 : index
    %1 = vector.load %arg3[%c0_1, %c0_2] : memref<128x128xf32, #tpu.memory_space<vmem>>, vector<128x128xf32>
    %cst = arith.constant dense<0.000000e+00> : vector<16x128xf32>
    %2 = tpu.matmul %0, %1, %cst {dimension_numbers = #tpu.dot_dimension_numbers<[1], [0], [0], [1], [0, 0, 1, 1], [], []>} : vector<16x128xf32>, vector<128x128xf32>, vector<16x128xf32> -> vector<16x128xf32>
    %c0_3 = arith.constant 0 : index
    %c0_4 = arith.constant 0 : index
    %3 = vector.load %arg4[%c0_3, %c0_4] : memref<1x128xf32, #tpu.memory_space<vmem>>, vector<1x128xf32>
    %4 = vector.broadcast %3 : vector<1x128xf32> to vector<16x128xf32>
    %5 = arith.addf %2, %4 : vector<16x128xf32>
    %c0_5 = arith.constant 0 : index
    %c0_6 = arith.constant 0 : index
    %6 = vector.load %arg2[%c0_5, %c0_6] : memref<16x128xf32, #tpu.memory_space<vmem>>, vector<16x128xf32>
    %c0_7 = arith.constant 0 : index
    %c0_8 = arith.constant 0 : index
    %7 = vector.load %arg5[%c0_7, %c0_8] : memref<128x128xf32, #tpu.memory_space<vmem>>, vector<128x128xf32>
    %cst_9 = arith.constant dense<0.000000e+00> : vector<16x128xf32>
    %8 = tpu.matmul %6, %7, %cst_9 {dimension_numbers = #tpu.dot_dimension_numbers<[1], [0], [0], [1], [0, 0, 1, 1], [], []>} : vector<16x128xf32>, vector<128x128xf32>, vector<16x128xf32> -> vector<16x128xf32>
    %c0_10 = arith.constant 0 : index
    %c0_11 = arith.constant 0 : index
    %9 = vector.load %arg6[%c0_10, %c0_11] : memref<1x128xf32, #tpu.memory_space<vmem>>, vector<1x128xf32>
    %10 = vector.broadcast %9 : vector<1x128xf32> to vector<16x128xf32>
    %11 = arith.addf %8, %10 : vector<16x128xf32>
    %12 = math.tanh %5 : vector<16x128xf32>
    %13 = math.tanh %11 : vector<16x128xf32>
    %c0_12 = arith.constant 0 : index
    %c0_13 = arith.constant 0 : index
    %14 = vector.load %arg7[%c0_12, %c0_13] : memref<128x384xf32, #tpu.memory_space<vmem>>, vector<128x384xf32>
    %cst_14 = arith.constant dense<0.000000e+00> : vector<16x384xf32>
    %15 = tpu.matmul %12, %14, %cst_14 {dimension_numbers = #tpu.dot_dimension_numbers<[1], [0], [0], [1], [0, 0, 1, 1], [], []>} : vector<16x128xf32>, vector<128x384xf32>, vector<16x384xf32> -> vector<16x384xf32>
    %c0_15 = arith.constant 0 : index
    %c0_16 = arith.constant 0 : index
    %16 = vector.load %arg8[%c0_15, %c0_16] : memref<1x384xf32, #tpu.memory_space<vmem>>, vector<1x384xf32>
    %17 = vector.broadcast %16 : vector<1x384xf32> to vector<16x384xf32>
    %18 = arith.addf %15, %17 : vector<16x384xf32>
    %19 = math.tanh %18 : vector<16x384xf32>
    %c0_17 = arith.constant 0 : index
    %c0_18 = arith.constant 0 : index
    %20 = vector.load %arg9[%c0_17, %c0_18] : memref<128x384xf32, #tpu.memory_space<vmem>>, vector<128x384xf32>
    %cst_19 = arith.constant dense<0.000000e+00> : vector<16x384xf32>
    %21 = tpu.matmul %13, %20, %cst_19 {dimension_numbers = #tpu.dot_dimension_numbers<[1], [0], [0], [1], [0, 0, 1, 1], [], []>} : vector<16x128xf32>, vector<128x384xf32>, vector<16x384xf32> -> vector<16x384xf32>
    %c0_20 = arith.constant 0 : index
    %c0_21 = arith.constant 0 : index
    %22 = vector.load %arg10[%c0_20, %c0_21] : memref<1x384xf32, #tpu.memory_space<vmem>>, vector<1x384xf32>
    %23 = vector.broadcast %22 : vector<1x384xf32> to vector<16x384xf32>
    %24 = arith.addf %21, %23 : vector<16x384xf32>
    %25 = math.tanh %24 : vector<16x384xf32>
    %26 = vector.extract_strided_slice %19 {offsets = [0, 0], sizes = [16, 128], strides = [1, 1]} : vector<16x384xf32> to vector<16x128xf32>
    %27 = vector.extract_strided_slice %25 {offsets = [0, 0], sizes = [16, 128], strides = [1, 1]} : vector<16x384xf32> to vector<16x128xf32>
    %28 = arith.mulf %26, %27 : vector<16x128xf32>
    %29 = vector.extract_strided_slice %19 {offsets = [0, 128], sizes = [16, 128], strides = [1, 1]} : vector<16x384xf32> to vector<16x128xf32>
    %30 = vector.extract_strided_slice %25 {offsets = [0, 128], sizes = [16, 128], strides = [1, 1]} : vector<16x384xf32> to vector<16x128xf32>
    %31 = arith.mulf %29, %30 : vector<16x128xf32>
    %32 = arith.addf %28, %31 : vector<16x128xf32>
    %33 = vector.extract_strided_slice %19 {offsets = [0, 256], sizes = [16, 128], strides = [1, 1]} : vector<16x384xf32> to vector<16x128xf32>
    %34 = vector.extract_strided_slice %25 {offsets = [0, 256], sizes = [16, 128], strides = [1, 1]} : vector<16x384xf32> to vector<16x128xf32>
    %35 = arith.mulf %33, %34 : vector<16x128xf32>
    %36 = arith.addf %32, %35 : vector<16x128xf32>
    %37 = math.tanh %36 : vector<16x128xf32>
    %c0_22 = arith.constant 0 : index
    %c0_23 = arith.constant 0 : index
    %38 = vector.load %arg11[%c0_22, %c0_23] : memref<16x128xf32, #tpu.memory_space<vmem>>, vector<16x128xf32>
    tpu.vector_store %arg11[%c0_22, %c0_23], %37 {strides = array<i32>} : memref<16x128xf32, #tpu.memory_space<vmem>>, vector<16x128xf32>,
    return
  }
  func.func @transform_0(%arg0: i32) -> (i32, i32) {
    %c0_i32 = arith.constant 0 : i32
    %c0_i32_0 = arith.constant 0 : i32
    return %arg0, %c0_i32 : i32, i32
  }
  func.func @transform_1(%arg0: i32) -> (i32, i32) {
    %c0_i32 = arith.constant 0 : i32
    %c0_i32_0 = arith.constant 0 : i32
    return %arg0, %c0_i32 : i32, i32
  }
  func.func @transform_2(%arg0: i32) -> (i32, i32) {
    %c0_i32 = arith.constant 0 : i32
    %c0_i32_0 = arith.constant 0 : i32
    %c0_i32_1 = arith.constant 0 : i32
    return %c0_i32, %c0_i32_0 : i32, i32
  }
  func.func @transform_3(%arg0: i32) -> (i32, i32) {
    %c0_i32 = arith.constant 0 : i32
    %c0_i32_0 = arith.constant 0 : i32
    %c0_i32_1 = arith.constant 0 : i32
    return %c0_i32, %c0_i32_0 : i32, i32
  }
  func.func @transform_4(%arg0: i32) -> (i32, i32) {
    %c0_i32 = arith.constant 0 : i32
    %c0_i32_0 = arith.constant 0 : i32
    %c0_i32_1 = arith.constant 0 : i32
    return %c0_i32, %c0_i32_0 : i32, i32
  }
  func.func @transform_5(%arg0: i32) -> (i32, i32) {
    %c0_i32 = arith.constant 0 : i32
    %c0_i32_0 = arith.constant 0 : i32
    %c0_i32_1 = arith.constant 0 : i32
    return %c0_i32, %c0_i32_0 : i32, i32
  }
  func.func @transform_6(%arg0: i32) -> (i32, i32) {
    %c0_i32 = arith.constant 0 : i32
    %c0_i32_0 = arith.constant 0 : i32
    %c0_i32_1 = arith.constant 0 : i32
    return %c0_i32, %c0_i32_0 : i32, i32
  }
  func.func @transform_7(%arg0: i32) -> (i32, i32) {
    %c0_i32 = arith.constant 0 : i32
    %c0_i32_0 = arith.constant 0 : i32
    %c0_i32_1 = arith.constant 0 : i32
    return %c0_i32, %c0_i32_0 : i32, i32
  }
  func.func @transform_8(%arg0: i32) -> (i32, i32) {
    %c0_i32 = arith.constant 0 : i32
    %c0_i32_0 = arith.constant 0 : i32
    %c0_i32_1 = arith.constant 0 : i32
    return %c0_i32, %c0_i32_0 : i32, i32
  }
  func.func @transform_9(%arg0: i32) -> (i32, i32) {
    %c0_i32 = arith.constant 0 : i32
    %c0_i32_0 = arith.constant 0 : i32
    %c0_i32_1 = arith.constant 0 : i32
    return %c0_i32, %c0_i32_0 : i32, i32
  }
  func.func @transform_10(%arg0: i32) -> (i32, i32) {
    %c0_i32 = arith.constant 0 : i32
    %c0_i32_0 = arith.constant 0 : i32
    return %arg0, %c0_i32 : i32, i32
  }
}

module attributes {stable_mosaic.version = 11 : i64} {
  func.func @mutan_fusion_kernel(%arg0: i32, %arg1: memref<16x128xf32, #tpu.memory_space<vmem>>, %arg2: memref<16x128xf32, #tpu.memory_space<vmem>>, %arg3: memref<128x128xf32, #tpu.memory_space<vmem>>, %arg4: memref<1x128xf32, #tpu.memory_space<vmem>>, %arg5: memref<128x128xf32, #tpu.memory_space<vmem>>, %arg6: memref<1x128xf32, #tpu.memory_space<vmem>>, %arg7: memref<128x384xf32, #tpu.memory_space<vmem>>, %arg8: memref<1x384xf32, #tpu.memory_space<vmem>>, %arg9: memref<128x384xf32, #tpu.memory_space<vmem>>, %arg10: memref<1x384xf32, #tpu.memory_space<vmem>>, %arg11: memref<16x128xf32, #tpu.memory_space<vmem>>) attributes {dimension_semantics = [#tpu.dimension_semantics<parallel>], iteration_bounds = array<i64: 1>, scalar_prefetch = 0 : i64, scratch_operands = 0 : i64, tpu.core_type = #tpu.core_type<tc>, window_params = [{transform_indices = @transform_0, window_bounds = array<i64: 16, 128>}, {transform_indices = @transform_1, window_bounds = array<i64: 16, 128>}, {pipeline_mode = #tpu.pipeline_mode<synchronous>, transform_indices = @transform_2, window_bounds = array<i64: 128, 128>}, {pipeline_mode = #tpu.pipeline_mode<synchronous>, transform_indices = @transform_3, window_bounds = array<i64: 1, 128>}, {pipeline_mode = #tpu.pipeline_mode<synchronous>, transform_indices = @transform_4, window_bounds = array<i64: 128, 128>}, {pipeline_mode = #tpu.pipeline_mode<synchronous>, transform_indices = @transform_5, window_bounds = array<i64: 1, 128>}, {pipeline_mode = #tpu.pipeline_mode<synchronous>, transform_indices = @transform_6, window_bounds = array<i64: 128, 384>}, {pipeline_mode = #tpu.pipeline_mode<synchronous>, transform_indices = @transform_7, window_bounds = array<i64: 1, 384>}, {pipeline_mode = #tpu.pipeline_mode<synchronous>, transform_indices = @transform_8, window_bounds = array<i64: 128, 384>}, {pipeline_mode = #tpu.pipeline_mode<synchronous>, transform_indices = @transform_9, window_bounds = array<i64: 1, 384>}, {transform_indices = @transform_10, window_bounds = array<i64: 16, 128>}]} {
    %c0 = arith.constant 0 : index
    %c0_0 = arith.constant 0 : index
    %0 = vector.load %arg1[%c0, %c0_0] : memref<16x128xf32, #tpu.memory_space<vmem>>, vector<16x128xf32>
    %c0_1 = arith.constant 0 : index
    %c0_2 = arith.constant 0 : index
    %1 = vector.load %arg3[%c0_1, %c0_2] : memref<128x128xf32, #tpu.memory_space<vmem>>, vector<128x128xf32>
    %cst = arith.constant dense<0.000000e+00> : vector<16x128xf32>
    %2 = tpu.matmul %0, %1, %cst {dimension_numbers = #tpu.dot_dimension_numbers<[1], [0], [0], [1], [0, 0, 1, 1], [], []>} : vector<16x128xf32>, vector<128x128xf32>, vector<16x128xf32> -> vector<16x128xf32>
    %c0_3 = arith.constant 0 : index
    %c0_4 = arith.constant 0 : index
    %3 = vector.load %arg4[%c0_3, %c0_4] : memref<1x128xf32, #tpu.memory_space<vmem>>, vector<1x128xf32>
    %4 = vector.broadcast %3 : vector<1x128xf32> to vector<16x128xf32>
    %5 = arith.addf %2, %4 : vector<16x128xf32>
    %c0_5 = arith.constant 0 : index
    %c0_6 = arith.constant 0 : index
    %6 = vector.load %arg2[%c0_5, %c0_6] : memref<16x128xf32, #tpu.memory_space<vmem>>, vector<16x128xf32>
    %c0_7 = arith.constant 0 : index
    %c0_8 = arith.constant 0 : index
    %7 = vector.load %arg5[%c0_7, %c0_8] : memref<128x128xf32, #tpu.memory_space<vmem>>, vector<128x128xf32>
    %cst_9 = arith.constant dense<0.000000e+00> : vector<16x128xf32>
    %8 = tpu.matmul %6, %7, %cst_9 {dimension_numbers = #tpu.dot_dimension_numbers<[1], [0], [0], [1], [0, 0, 1, 1], [], []>} : vector<16x128xf32>, vector<128x128xf32>, vector<16x128xf32> -> vector<16x128xf32>
    %c0_10 = arith.constant 0 : index
    %c0_11 = arith.constant 0 : index
    %9 = vector.load %arg6[%c0_10, %c0_11] : memref<1x128xf32, #tpu.memory_space<vmem>>, vector<1x128xf32>
    %10 = vector.broadcast %9 : vector<1x128xf32> to vector<16x128xf32>
    %11 = arith.addf %8, %10 : vector<16x128xf32>
    %12 = math.tanh %5 : vector<16x128xf32>
    %13 = math.tanh %11 : vector<16x128xf32>
    %c0_12 = arith.constant 0 : index
    %c0_13 = arith.constant 0 : index
    %14 = vector.load %arg7[%c0_12, %c0_13] : memref<128x384xf32, #tpu.memory_space<vmem>>, vector<128x384xf32>
    %cst_14 = arith.constant dense<0.000000e+00> : vector<16x384xf32>
    %15 = tpu.matmul %12, %14, %cst_14 {dimension_numbers = #tpu.dot_dimension_numbers<[1], [0], [0], [1], [0, 0, 1, 1], [], []>} : vector<16x128xf32>, vector<128x384xf32>, vector<16x384xf32> -> vector<16x384xf32>
    %c0_15 = arith.constant 0 : index
    %c0_16 = arith.constant 0 : index
    %16 = vector.load %arg8[%c0_15, %c0_16] : memref<1x384xf32, #tpu.memory_space<vmem>>, vector<1x384xf32>
    %17 = vector.broadcast %16 : vector<1x384xf32> to vector<16x384xf32>
    %18 = arith.addf %15, %17 : vector<16x384xf32>
    %19 = math.tanh %18 : vector<16x384xf32>
    %c0_17 = arith.constant 0 : index
    %c0_18 = arith.constant 0 : index
    %20 = vector.load %arg9[%c0_17, %c0_18] : memref<128x384xf32, #tpu.memory_space<vmem>>, vector<128x384xf32>
    %cst_19 = arith.constant dense<0.000000e+00> : vector<16x384xf32>
    %21 = tpu.matmul %13, %20, %cst_19 {dimension_numbers = #tpu.dot_dimension_numbers<[1], [0], [0], [1], [0, 0, 1, 1], [], []>} : vector<16x128xf32>, vector<128x384xf32>, vector<16x384xf32> -> vector<16x384xf32>
    %c0_20 = arith.constant 0 : index
    %c0_21 = arith.constant 0 : index
    %22 = vector.load %arg10[%c0_20, %c0_21] : memref<1x384xf32, #tpu.memory_space<vmem>>, vector<1x384xf32>
    %23 = vector.broadcast %22 : vector<1x384xf32> to vector<16x384xf32>
    %24 = arith.addf %21, %23 : vector<16x384xf32>
    %25 = math.tanh %24 : vector<16x384xf32>
    %26 = vector.extract_strided_slice %19 {offsets = [0, 0], sizes = [16, 128], strides = [1, 1]} : vector<16x384xf32> to vector<16x128xf32>
    %27 = vector.extract_strided_slice %25 {offsets = [0, 0], sizes = [16, 128], strides = [1, 1]} : vector<16x384xf32> to vector<16x128xf32>
    %28 = arith.mulf %26, %27 : vector<16x128xf32>
    %29 = vector.extract_strided_slice %19 {offsets = [0, 128], sizes = [16, 128], strides = [1, 1]} : vector<16x384xf32> to vector<16x128xf32>
    %30 = vector.extract_strided_slice %25 {offsets = [0, 128], sizes = [16, 128], strides = [1, 1]} : vector<16x384xf32> to vector<16x128xf32>
    %31 = arith.mulf %29, %30 : vector<16x128xf32>
    %32 = arith.addf %28, %31 : vector<16x128xf32>
    %33 = vector.extract_strided_slice %19 {offsets = [0, 256], sizes = [16, 128], strides = [1, 1]} : vector<16x384xf32> to vector<16x128xf32>
    %34 = vector.extract_strided_slice %25 {offsets = [0, 256], sizes = [16, 128], strides = [1, 1]} : vector<16x384xf32> to vector<16x128xf32>
    %35 = arith.mulf %33, %34 : vector<16x128xf32>
    %36 = arith.addf %32, %35 : vector<16x128xf32>
    %37 = math.tanh %36 : vector<16x128xf32>
    %c0_22 = arith.constant 0 : index
    %c0_23 = arith.constant 0 : index
    %38 = vector.load %arg11[%c0_22, %c0_23] : memref<16x128xf32, #tpu.memory_space<vmem>>, vector<16x128xf32>
    tpu.vector_store %arg11[%c0_22, %c0_23], %37 {strides = array<i32>} : memref<16x128xf32, #tpu.memory_space<vmem>>, vector<16x128xf32>,
    return
  }
  func.func @transform_0(%arg0: i32) -> (i32, i32) {
    %c0_i32 = arith.constant 0 : i32
    %c0_i32_0 = arith.constant 0 : i32
    return %arg0, %c0_i32 : i32, i32
  }
  func.func @transform_1(%arg0: i32) -> (i32, i32) {
    %c0_i32 = arith.constant 0 : i32
    %c0_i32_0 = arith.constant 0 : i32
    return %arg0, %c0_i32 : i32, i32
  }
  func.func @transform_2(%arg0: i32) -> (i32, i32) {
    %c0_i32 = arith.constant 0 : i32
    %c0_i32_0 = arith.constant 0 : i32
    %c0_i32_1 = arith.constant 0 : i32
    return %c0_i32, %c0_i32_0 : i32, i32
  }
  func.func @transform_3(%arg0: i32) -> (i32, i32) {
    %c0_i32 = arith.constant 0 : i32
    %c0_i32_0 = arith.constant 0 : i32
    %c0_i32_1 = arith.constant 0 : i32
    return %c0_i32, %c0_i32_0 : i32, i32
  }
  func.func @transform_4(%arg0: i32) -> (i32, i32) {
    %c0_i32 = arith.constant 0 : i32
    %c0_i32_0 = arith.constant 0 : i32
    %c0_i32_1 = arith.constant 0 : i32
    return %c0_i32, %c0_i32_0 : i32, i32
  }
  func.func @transform_5(%arg0: i32) -> (i32, i32) {
    %c0_i32 = arith.constant 0 : i32
    %c0_i32_0 = arith.constant 0 : i32
    %c0_i32_1 = arith.constant 0 : i32
    return %c0_i32, %c0_i32_0 : i32, i32
  }
  func.func @transform_6(%arg0: i32) -> (i32, i32) {
    %c0_i32 = arith.constant 0 : i32
    %c0_i32_0 = arith.constant 0 : i32
    %c0_i32_1 = arith.constant 0 : i32
    return %c0_i32, %c0_i32_0 : i32, i32
  }
  func.func @transform_7(%arg0: i32) -> (i32, i32) {
    %c0_i32 = arith.constant 0 : i32
    %c0_i32_0 = arith.constant 0 : i32
    %c0_i32_1 = arith.constant 0 : i32
    return %c0_i32, %c0_i32_0 : i32, i32
  }
  func.func @transform_8(%arg0: i32) -> (i32, i32) {
    %c0_i32 = arith.constant 0 : i32
    %c0_i32_0 = arith.constant 0 : i32
    %c0_i32_1 = arith.constant 0 : i32
    return %c0_i32, %c0_i32_0 : i32, i32
  }
  func.func @transform_9(%arg0: i32) -> (i32, i32) {
    %c0_i32 = arith.constant 0 : i32
    %c0_i32_0 = arith.constant 0 : i32
    %c0_i32_1 = arith.constant 0 : i32
    return %c0_i32, %c0_i32_0 : i32, i32
  }
  func.func @transform_10(%arg0: i32) -> (i32, i32) {
    %c0_i32 = arith.constant 0 : i32
    %c0_i32_0 = arith.constant 0 : i32
    return %arg0, %c0_i32 : i32, i32
  }
}

</mosaic_0001>

<bundles_post_ra>
// kernel: tpu_custom_call.1
= control target key start
LH: loop header
LB: loop body
LE: loop exit
PB: predicated region body
PF: predicated region fallthrough
CT: control target
= control target key end

     0   :  { %15 = vsyncpa [#allocation3], 0  ;;  %s1333_s0 = inlined_call_operand.hbm [shape: f32[16,128], index: 0, kind: input, shape index: {}]   ;;  %s1334_s1 = inlined_call_operand.hbm [shape: f32[16,128], index: 1, kind: input, shape index: {}]   ;;  %s1335_s2 = inlined_call_operand.hbm [shape: f32[128,128], index: 2, kind: input, shape index: {}]   ;;  %s1336_s3 = inlined_call_operand.vmem [shape: f32[1,128], index: 3, kind: input, shape index: {}]   ;;  %s1337_s4 = inlined_call_operand.hbm [shape: f32[128,128], index: 4, kind: input, shape index: {}]   ;;  %s1338_s5 = inlined_call_operand.vmem [shape: f32[1,128], index: 5, kind: input, shape index: {}]   ;;  %s1339_s6 = inlined_call_operand.hbm [shape: f32[128,384], index: 6, kind: input, shape index: {}]   ;;  %s1340_s7 = inlined_call_operand.vmem [shape: f32[1,384], index: 7, kind: input, shape index: {}]   ;;  %s1341_s8 = inlined_call_operand.hbm [shape: f32[128,384], index: 8, kind: input, shape index: {}]   ;;  %s1342_s9 = inlined_call_operand.vmem [shape: f32[1,384], index: 9, kind: input, shape index: {}]   ;;  %s1343_s10 = inlined_call_operand.hbm [shape: f32[16,128], index: 10, kind: output, shape index: {}]  }
   0x1   :  { %16 = vsyncpa [#allocation6], 0 }
   0x2   :  { %17 = vsyncpa [#allocation9], 0 }
   0x3   :  { %18 = vsyncpa [#allocation12], 0 }
   0x4   :  { %19 = vsyncpa [#allocation4], 0  ;;  %s1214_s13 = smov [#allocation5]   ;;  %s1215_s15 = smov [#allocation8]  }
   0x5   :  { %s37_s14 = sshll.u32 %s1214_s13, 4  ;;  %s63_s16 = sshll.u32 %s1215_s15, 4  ;;  %s38_s14 = int_to_ptr.vmem [resolvable:$true] %s37_s14  ;;  %s64_s16 = int_to_ptr.vmem [resolvable:$true] %s63_s16 }
   0x6   :  { %s1072_s17 = scalar_lea.vmem %s38_s14, 256  ;;  %p1077_p1 = scmp.lt.s32.totalorder %s38_s14, %s38_s14 }
   0x7   :  { %p1073_p0 = scmp.ne.s32.totalorder %s38_s14, %s1072_s17  ;;  %p1078_p2 = scmp.lt.s32.totalorder %s1072_s17, %s1072_s17 }
   0x9   :  { %p1079_p3 = por %p1078_p2, %p1077_p1 }
   0xb   :  { %p1080_p4 = pnand %p1079_p3, %p1073_p0 }
   0xd   :  { %1083 = shalt.err (!%p1080_p4)
}
   0xe   :  { %s1216_s18 = smov 128   ;;  %s1217_s19 = smov 8  }
   0xf   :  { %43 = dma.hbm_to_vmem [thread:$0]  %s1334_s1, 256, %s38_s14, [#allocation6], %s1216_s18, %s1216_s18, %s1217_s19  }
  0x10   :  { %s1092_s22 = scalar_lea.vmem %s64_s16, 2048  ;;  %p1097_p6 = scmp.lt.s32.totalorder %s64_s16, %s64_s16 }
  0x11   :  { %p1093_p5 = scmp.ne.s32.totalorder %s64_s16, %s1092_s22  ;;  %p1098_p7 = scmp.lt.s32.totalorder %s1092_s22, %s1092_s22 }
  0x13   :  { %p1099_p8 = por %p1098_p7, %p1097_p6 }
  0x15   :  { %p1100_p9 = pnand %p1099_p8, %p1093_p5 }
  0x17   :  { %1103 = shalt.err (!%p1100_p9)
}
  0x18   :  { %69 = dma.hbm_to_vmem [thread:$0]  %s1337_s4, 2048, %s64_s16, [#allocation9], %s1216_s18, %s1216_s18, %s1217_s19  }
  0x19   :  { %s1218_s25 = smov [#allocation2]   ;;  %s1219_s27 = smov [#allocation7]  }
  0x1a   :  { %s25_s26 = sshll.u32 %s1218_s25, 4  ;;  %s49_s28 = sshll.u32 %s1219_s27, 4  ;;  %s26_s26 = int_to_ptr.vmem [resolvable:$true] %s25_s26  ;;  %s50_s28 = int_to_ptr.vmem [resolvable:$true] %s49_s28 }
  0x1b   :  { %s1112_s1 = scalar_lea.vmem %s26_s26, 256  ;;  %p1117_p11 = scmp.lt.s32.totalorder %s26_s26, %s26_s26 }
  0x1c   :  { %p1113_p10 = scmp.ne.s32.totalorder %s26_s26, %s1112_s1  ;;  %p1118_p12 = scmp.lt.s32.totalorder %s1112_s1, %s1112_s1 }
  0x1e   :  { %p1119_p13 = por %p1118_p12, %p1117_p11 }
  0x20   :  { %p1120_p0 = pnand %p1119_p13, %p1113_p10 }
  0x22   :  { %1123 = shalt.err (!%p1120_p0)
}
  0x23   :  { %31 = dma.hbm_to_vmem [thread:$0]  %s1333_s0, 256, %s26_s26, [#allocation3], %s1216_s18, %s1216_s18, %s1217_s19  }
  0x24   :  { %s1132_s4 = scalar_lea.vmem %s50_s28, 2048  ;;  %p1137_p2 = scmp.lt.s32.totalorder %s50_s28, %s50_s28 }
  0x25   :  { %p1133_p1 = scmp.ne.s32.totalorder %s50_s28, %s1132_s4  ;;  %p1138_p3 = scmp.lt.s32.totalorder %s1132_s4, %s1132_s4 }
  0x27   :  { %p1139_p4 = por %p1138_p3, %p1137_p2 }
  0x29   :  { %p1140_p5 = pnand %p1139_p4, %p1133_p1 }
  0x2b   :  { %1143 = shalt.err (!%p1140_p5)
}
  0x2c   :  { %55 = dma.hbm_to_vmem [thread:$0]  %s1335_s2, 2048, %s50_s28, [#allocation6], %s1216_s18, %s1216_s18, %s1217_s19  }
  0x2d   :  { %s1220_s13 = smov [#allocation10]  }
  0x2e   :  { %s77_s14 = sshll.u32 %s1220_s13, 4  ;;  %s78_s14 = int_to_ptr.vmem [resolvable:$true] %s77_s14 }
  0x2f   :  { %s1152_s15 = scalar_lea.vmem %s78_s14, 6144  ;;  %p1157_p7 = scmp.lt.s32.totalorder %s78_s14, %s78_s14 }
  0x30   :  { %p1153_p6 = scmp.ne.s32.totalorder %s78_s14, %s1152_s15  ;;  %p1158_p8 = scmp.lt.s32.totalorder %s1152_s15, %s1152_s15 }
  0x32   :  { %p1159_p9 = por %p1158_p8, %p1157_p7 }
  0x34   :  { %p1160_p10 = pnand %p1159_p9, %p1153_p6 }
  0x36   :  { %1163 = shalt.err (!%p1160_p10)
}
  0x37   :  { %s1221_s0 = smov 384   ;;  %s1222_s16 = smov 24  }
  0x38   :  { %83 = dma.hbm_to_vmem [thread:$0]  %s1339_s6, 6144, %s78_s14, [#allocation9], %s1221_s0, %s1221_s0, %s1222_s16  }
  0x39   :  { %s1223_s21 = smov [#allocation11]  }
  0x3a   :  { %s91_s22 = sshll.u32 %s1223_s21, 4  ;;  %s92_s22 = int_to_ptr.vmem [resolvable:$true] %s91_s22 }
  0x3b   :  { %s1172_s2 = scalar_lea.vmem %s92_s22, 6144  ;;  %p1177_p12 = scmp.lt.s32.totalorder %s92_s22, %s92_s22 }
  0x3c   :  { %p1173_p11 = scmp.ne.s32.totalorder %s92_s22, %s1172_s2  ;;  %p1178_p13 = scmp.lt.s32.totalorder %s1172_s2, %s1172_s2 }
  0x3e   :  { %p1179_p0 = por %p1178_p13, %p1177_p12 }
  0x40   :  { %p1180_p1 = pnand %p1179_p0, %p1173_p11 }
  0x42   :  { %1183 = shalt.err (!%p1180_p1)
}
  0x43   :  { %97 = dma.hbm_to_vmem [thread:$0]  %s1341_s8, 6144, %s92_s22, [#allocation12], %s1221_s0, %s1221_s0, %s1222_s16  }
  0x44   :  { %1204 = dma.done.wait [#allocation3], 256  }
  0x45   :  { %1205 = vsyncadd [#allocation3], 4294967040 }
  0x46   :  { %1206 = dma.done.wait [#allocation6], 2304  }
  0x47   :  { %1207 = vsyncadd [#allocation6], 4294964992 }
  0x48   :  { %1208 = dma.done.wait [#allocation9], 8192  }
  0x49   :  { %1209 = vsyncadd [#allocation9], 4294959104 }
  0x4a   :  { %1210 = dma.done.wait [#allocation12], 6144  }
  0x4b   :  { %1211 = vsyncadd [#allocation12], 4294961152  ;;  %v135_v0 = vld [vmem:[#allocation7 + $0x78] sm:$0xff]  ;;  %v134_v1 = vld [vmem:[#allocation7 + $0x70] sm:$0xff] }
  0x4c   :  { %876 = vmatprep.subr.mxu0 %v135_v0  ;;  %v133_v2 = vld [vmem:[#allocation7 + $0x68] sm:$0xff]  ;;  %v132_v3 = vld [vmem:[#allocation7 + $0x60] sm:$0xff]  ;;  %v235_v4 = vld [vmem:[#allocation8 + $0x78] sm:$0xff] }
  0x4d   :  { %877 = vmatpush3.msra.mxu0 %v135_v0  ;;  %v118_v5 = vld [vmem:[#allocation2] sm:$0xff]  ;;  %v131_v6 = vld [vmem:[#allocation7 + $0x58] sm:$0xff]  ;;  %911 = vmatprep.subr.mxu1 %v235_v4  ;;  %v234_v7 = vld [vmem:[#allocation8 + $0x70] sm:$0xff] }
  0x4e   :  { %878 = vmatprep.subr.mxu0 %v134_v1  ;;  %912 = vmatpush3.msra.mxu1 %v235_v4  ;;  %v130_v8 = vld [vmem:[#allocation7 + $0x50] sm:$0xff]  ;;  %v233_v9 = vld [vmem:[#allocation8 + $0x68] sm:$0xff]  ;;  %v232_v11 = vld [vmem:[#allocation8 + $0x60] sm:$0xff] }
  0x4f   :  { %879 = vmatpush3.msra.mxu0 %v134_v1  ;;  %908 = vmatprep.mubr.f32.mxu0 %v118_v5  ;;  %v129_v10 = vld [vmem:[#allocation7 + $0x48] sm:$0xff]  ;;  %v128_v12 = vld [vmem:[#allocation7 + $0x40] sm:$0xff]  ;;  %v231_v13 = vld [vmem:[#allocation8 + $0x58] sm:$0xff] }
  0x50   :  { %880 = vmatprep.subr.mxu0 %v133_v2  ;;  %913 = vmatprep.subr.mxu1 %v234_v7  ;;  %v127_v14 = vld [vmem:[#allocation7 + $0x38] sm:$0xff]  ;;  %v230_v15 = vld [vmem:[#allocation8 + $0x50] sm:$0xff]  ;;  %v229_v17 = vld [vmem:[#allocation8 + $0x48] sm:$0xff] }
  0x51   :  { %881 = vmatpush3.msra.mxu0 %v133_v2  ;;  %914 = vmatpush3.msra.mxu1 %v234_v7  ;;  %v126_v16 = vld [vmem:[#allocation7 + $0x30] sm:$0xff]  ;;  %v125_v18 = vld [vmem:[#allocation7 + $0x28] sm:$0xff]  ;;  %v228_v19 = vld [vmem:[#allocation8 + $0x40] sm:$0xff] }
  0x52   :  { %882 = vmatprep.subr.mxu0 %v132_v3  ;;  %915 = vmatprep.subr.mxu1 %v233_v9  ;;  %v124_v20 = vld [vmem:[#allocation7 + $0x20] sm:$0xff]  ;;  %v227_v21 = vld [vmem:[#allocation8 + $0x38] sm:$0xff]  ;;  %v226_v23 = vld [vmem:[#allocation8 + $0x30] sm:$0xff] }
  0x53   :  { %883 = vmatpush3.msra.mxu0 %v132_v3  ;;  %916 = vmatpush3.msra.mxu1 %v233_v9  ;;  %v123_v22 = vld [vmem:[#allocation7 + $0x18] sm:$0xff]  ;;  %v122_v24 = vld [vmem:[#allocation7 + $0x10] sm:$0xff]  ;;  %v225_v25 = vld [vmem:[#allocation8 + $0x28] sm:$0xff] }
  0x54   :  { %884 = vmatprep.subr.mxu0 %v131_v6  ;;  %917 = vmatprep.subr.mxu1 %v232_v11  ;;  %v121_v26 = vld [vmem:[#allocation7 + $0x8] sm:$0xff]  ;;  %v224_v27 = vld [vmem:[#allocation8 + $0x20] sm:$0xff]  ;;  %v223_v29 = vld [vmem:[#allocation8 + $0x18] sm:$0xff] }
  0x55   :  { %885 = vmatpush3.msra.mxu0 %v131_v6  ;;  %918 = vmatpush3.msra.mxu1 %v232_v11  ;;  %v120_v28 = vld [vmem:[#allocation7] sm:$0xff]  ;;  %v119_v30 = vld [vmem:[#allocation2 + $0x8] sm:$0xff]  ;;  %v222_v31 = vld [vmem:[#allocation8 + $0x10] sm:$0xff] }
  0x56   :  { %886 = vmatprep.subr.mxu0 %v130_v8  ;;  %919 = vmatprep.subr.mxu1 %v231_v13  ;;  %v218_v32 = vld [vmem:[#allocation5] sm:$0xff]  ;;  %v221_v33 = vld [vmem:[#allocation8 + $0x8] sm:$0xff]  ;;  %v220_v36 = vld [vmem:[#allocation8] sm:$0xff] }
  0x57   :  { %887 = vmatpush3.msra.mxu0 %v130_v8  ;;  %920 = vmatpush3.msra.mxu1 %v231_v13  ;;  %v368_v34 = vld [vmem:[#allocation10 + $0x170] sm:$0xff]  ;;  %v367_v35 = vld [vmem:[#allocation10 + $0x168] sm:$0xff]  ;;  %v365_v37 = vld [vmem:[#allocation10 + $0x158] sm:$0xff] }
  0x58   :  { %888 = vmatprep.subr.mxu0 %v129_v10  ;;  %921 = vmatprep.subr.mxu1 %v230_v15  ;;  %v364_v38 = vld [vmem:[#allocation10 + $0x150] sm:$0xff]  ;;  %v219_v39 = vld [vmem:[#allocation5 + $0x8] sm:$0xff]  ;;  %v362_v41 = vld [vmem:[#allocation10 + $0x140] sm:$0xff] }
  0x59   :  { %889 = vmatpush3.msra.mxu0 %v129_v10  ;;  %922 = vmatpush3.msra.mxu1 %v230_v15  ;;  %v369_v40 = vld [vmem:[#allocation10 + $0x178] sm:$0xff]  ;;  %v366_v42 = vld [vmem:[#allocation10 + $0x160] sm:$0xff]  ;;  %v359_v44 = vld [vmem:[#allocation10 + $0x128] sm:$0xff] }
  0x5a   :  { %890 = vmatprep.subr.mxu0 %v128_v12  ;;  %923 = vmatprep.subr.mxu1 %v229_v17  ;;  %v361_v43 = vld [vmem:[#allocation10 + $0x138] sm:$0xff]  ;;  %v363_v45 = vld [vmem:[#allocation10 + $0x148] sm:$0xff]  ;;  %v358_v46 = vld [vmem:[#allocation10 + $0x120] sm:$0xff] }
  0x5b   :  { %891 = vmatpush3.msra.mxu0 %v128_v12  ;;  %924 = vmatpush3.msra.mxu1 %v229_v17  ;;  %v356_v47 = vld [vmem:[#allocation10 + $0x110] sm:$0xff]  ;;  %v355_v49 = vld [vmem:[#allocation10 + $0x108] sm:$0xff]  ;;  %v353_v50 = vld [vmem:[#allocation10 + $0xf8] sm:$0xff] }
  0x5c   :  { %892 = vmatprep.subr.mxu0 %v127_v14  ;;  %925 = vmatprep.subr.mxu1 %v228_v19  ;;  %v360_v48 = vld [vmem:[#allocation10 + $0x130] sm:$0xff]  ;;  %v357_v51 = vld [vmem:[#allocation10 + $0x118] sm:$0xff]  ;;  %v350_v53 = vld [vmem:[#allocation10 + $0xe0] sm:$0xff] }
  0x5d   :  { %893 = vmatpush3.msra.mxu0 %v127_v14  ;;  %926 = vmatpush3.msra.mxu1 %v228_v19  ;;  %v352_v52 = vld [vmem:[#allocation10 + $0xf0] sm:$0xff]  ;;  %v354_v54 = vld [vmem:[#allocation10 + $0x100] sm:$0xff]  ;;  %v349_v55 = vld [vmem:[#allocation10 + $0xd8] sm:$0xff] }
  0x5e   :  { %894 = vmatprep.subr.mxu0 %v126_v16  ;;  %927 = vmatprep.subr.mxu1 %v227_v21  ;;  %v351_v56 = vld [vmem:[#allocation10 + $0xe8] sm:$0xff]  ;;  %v346_v58 = vld [vmem:[#allocation10 + $0xc0] sm:$0xff]  ;;  %v348_v59 = vld [vmem:[#allocation10 + $0xd0] sm:$0xff] }
  0x5f   :  { %895 = vmatpush3.msra.mxu0 %v126_v16  ;;  %928 = vmatpush3.msra.mxu1 %v227_v21  ;;  %v347_v57 = vld [vmem:[#allocation10 + $0xc8] sm:$0xff]  ;;  %v344_v60 = vld [vmem:[#allocation10 + $0xb0] sm:$0xff]  ;;  %v345_v62 = vld [vmem:[#allocation10 + $0xb8] sm:$0xff]  ;;  %v1224_v21 = vmov 0.0  }
  0x60   :  { %896 = vmatprep.subr.mxu0 %v125_v18  ;;  %929 = vmatprep.subr.mxu1 %v226_v23  ;;  %v343_v61 = vld [vmem:[#allocation10 + $0xa8] sm:$0xff]  ;;  %v341_v63 = vld [vmem:[#allocation10 + $0x98] sm:$0xff]  ;;  %v340_v0 = vld [vmem:[#allocation10 + $0x90] sm:$0xff] }
  0x61   :  { %897 = vmatpush3.msra.mxu0 %v125_v18  ;;  %930 = vmatpush3.msra.mxu1 %v226_v23  ;;  %v342_v1 = vld [vmem:[#allocation10 + $0xa0] sm:$0xff]  ;;  %v337_v3 = vld [vmem:[#allocation10 + $0x78] sm:$0xff]  ;;  %v339_v4 = vld [vmem:[#allocation10 + $0x88] sm:$0xff] }
  0x62   :  { %898 = vmatprep.subr.mxu0 %v124_v20  ;;  %931 = vmatprep.subr.mxu1 %v225_v25  ;;  %v338_v2 = vld [vmem:[#allocation10 + $0x80] sm:$0xff]  ;;  %v335_v5 = vld [vmem:[#allocation10 + $0x68] sm:$0xff]  ;;  %v336_v7 = vld [vmem:[#allocation10 + $0x70] sm:$0xff] }
  0x63   :  { %899 = vmatpush3.msra.mxu0 %v124_v20  ;;  %932 = vmatpush3.msra.mxu1 %v225_v25  ;;  %v334_v6 = vld [vmem:[#allocation10 + $0x60] sm:$0xff]  ;;  %v332_v8 = vld [vmem:[#allocation10 + $0x50] sm:$0xff]  ;;  %v331_v9 = vld [vmem:[#allocation10 + $0x48] sm:$0xff] }
  0x64   :  { %900 = vmatprep.subr.mxu0 %v123_v22  ;;  %933 = vmatprep.subr.mxu1 %v224_v27  ;;  %v333_v10 = vld [vmem:[#allocation10 + $0x58] sm:$0xff]  ;;  %v328_v12 = vld [vmem:[#allocation10 + $0x30] sm:$0xff]  ;;  %v330_v13 = vld [vmem:[#allocation10 + $0x40] sm:$0xff] }
  0x65   :  { %901 = vmatpush3.msra.mxu0 %v123_v22  ;;  %934 = vmatpush3.msra.mxu1 %v224_v27  ;;  %v329_v11 = vld [vmem:[#allocation10 + $0x38] sm:$0xff]  ;;  %v326_v14 = vld [vmem:[#allocation10 + $0x20] sm:$0xff]  ;;  %v327_v16 = vld [vmem:[#allocation10 + $0x28] sm:$0xff] }
  0x66   :  { %902 = vmatprep.subr.mxu0 %v122_v24  ;;  %935 = vmatprep.subr.mxu1 %v223_v29  ;;  %v325_v15 = vld [vmem:[#allocation10 + $0x18] sm:$0xff]  ;;  %v323_v17 = vld [vmem:[#allocation10 + $0x8] sm:$0xff]  ;;  %v322_v18 = vld [vmem:[#allocation10] sm:$0xff] }
  0x67   :  { %903 = vmatpush3.msra.mxu0 %v122_v24  ;;  %936 = vmatpush3.msra.mxu1 %v223_v29  ;;  %v324_v19 = vld [vmem:[#allocation10 + $0x10] sm:$0xff]  ;;  %v592_v22 = vld [vmem:[#allocation11 + $0x178] sm:$0xff]  ;;  %v802_v23 = vld [vmem:[%s1336_s3] ss:$0 sm:$0xff] }
  0x68   :  { %904 = vmatprep.subr.mxu0 %v121_v26  ;;  %937 = vmatprep.subr.mxu1 %v222_v31  ;;  %v591_v20 = vld [vmem:[#allocation11 + $0x170] sm:$0xff] }
  0x69   :  { %905 = vmatpush3.msra.mxu0 %v121_v26  ;;  %938 = vmatpush3.msra.mxu1 %v222_v31 }
  0x6a   :  { %906 = vmatprep.subr.mxu0 %v120_v28  ;;  %943 = vmatprep.mubr.f32.mxu1 %v218_v32  ;;  %v587_v32 = vld [vmem:[#allocation11 + $0x150] sm:$0xff] }
  0x6b   :  { %907 = vmatpush3.msra.mxu0 %v120_v28  ;;  %939 = vmatprep.subr.mxu1 %v221_v33  ;;  %v590_v28 = vld [vmem:[#allocation11 + $0x168] sm:$0xff] }
  0x6c   :  { %909 = vmatmul.mubr.f32.vlgmr.msra.gmra.mxu0 %v119_v30  ;;  %387 = vmatprep.subr.mxu0 %v368_v34  ;;  %v588_v30 = vld [vmem:[#allocation11 + $0x158] sm:$0xff]  ;;  %v585_v34 = vld [vmem:[#allocation11 + $0x140] sm:$0xff] }
  0x6d   :  { %940 = vmatpush3.msra.mxu1 %v221_v33  ;;  %388 = vmatpush1.msra.mxu0 %v367_v35  ;;  %v589_v33 = vld [vmem:[#allocation11 + $0x160] sm:$0xff]  ;;  %v584_v35 = vld [vmem:[#allocation11 + $0x138] sm:$0xff] }
  0x6e   :  { %941 = vmatprep.subr.mxu1 %v220_v36  ;;  %389 = vmatprep.subr.mxu0 %v365_v37  ;;  %v582_v37 = vld [vmem:[#allocation11 + $0x128] sm:$0xff] }
  0x6f   :  { %942 = vmatpush3.msra.mxu1 %v220_v36  ;;  %390 = vmatpush1.msra.mxu0 %v364_v38  ;;  %v586_v36 = vld [vmem:[#allocation11 + $0x148] sm:$0xff]  ;;  %v581_v38 = vld [vmem:[#allocation11 + $0x120] sm:$0xff] }
  0x70   :  { %944 = vmatmul.mubr.f32.vlgmr.msra.gmra.mxu1 %v219_v39  ;;  %946 = vmatprep.subr.mxu1 %v369_v40  ;;  %v583_v39 = vld [vmem:[#allocation11 + $0x130] sm:$0xff] }
  0x71   :  { %947 = vmatpush3.msra.mxu1 %v369_v40  ;;  %391 = vmatprep.subr.mxu0 %v362_v41  ;;  %v579_v41 = vld [vmem:[#allocation11 + $0x110] sm:$0xff] }
  0x72   :  { %948 = vmatprep.subr.mxu1 %v366_v42  ;;  %392 = vmatpush1.msra.mxu0 %v361_v43  ;;  %v580_v43 = vld [vmem:[#allocation11 + $0x118] sm:$0xff] }
  0x73   :  { %949 = vmatpush3.msra.mxu1 %v366_v42  ;;  %393 = vmatprep.subr.mxu0 %v359_v44  ;;  %v578_v42 = vld [vmem:[#allocation11 + $0x108] sm:$0xff]  ;;  %v576_v44 = vld [vmem:[#allocation11 + $0xf8] sm:$0xff] }
  0x74   :  { %950 = vmatprep.subr.mxu1 %v363_v45  ;;  %394 = vmatpush1.msra.mxu0 %v358_v46  ;;  %v575_v46 = vld [vmem:[#allocation11 + $0xf0] sm:$0xff] }
  0x75   :  { %951 = vmatpush3.msra.mxu1 %v363_v45  ;;  %395 = vmatprep.subr.mxu0 %v356_v47  ;;  %v803_v45 = vld [vmem:[%s1338_s5] ss:$0 sm:$0xff] }
  0x76   :  { %952 = vmatprep.subr.mxu1 %v360_v48  ;;  %396 = vmatpush1.msra.mxu0 %v355_v49  ;;  %v577_v47 = vld [vmem:[#allocation11 + $0x100] sm:$0xff] }
  0x77   :  { %953 = vmatpush3.msra.mxu1 %v360_v48  ;;  %397 = vmatprep.subr.mxu0 %v353_v50  ;;  %v573_v49 = vld [vmem:[#allocation11 + $0xe0] sm:$0xff]  ;;  %v572_v50 = vld [vmem:[#allocation11 + $0xd8] sm:$0xff] }
  0x78   :  { %954 = vmatprep.subr.mxu1 %v357_v51  ;;  %398 = vmatpush1.msra.mxu0 %v352_v52 }
  0x79   :  { %955 = vmatpush3.msra.mxu1 %v357_v51  ;;  %399 = vmatprep.subr.mxu0 %v350_v53  ;;  %v574_v51 = vld [vmem:[#allocation11 + $0xe8] sm:$0xff] }
  0x7a   :  { %956 = vmatprep.subr.mxu1 %v354_v54  ;;  %400 = vmatpush1.msra.mxu0 %v349_v55  ;;  %v570_v53 = vld [vmem:[#allocation11 + $0xc8] sm:$0xff]  ;;  %v571_v55 = vld [vmem:[#allocation11 + $0xd0] sm:$0xff] }
  0x7b   :  { %957 = vmatpush3.msra.mxu1 %v354_v54  ;;  %401 = vmatprep.subr.mxu0 %v347_v57  ;;  %v569_v54 = vld [vmem:[#allocation11 + $0xc0] sm:$0xff]  ;;  %v566_v57 = vld [vmem:[#allocation11 + $0xa8] sm:$0xff] }
  0x7c   :  { %958 = vmatprep.subr.mxu1 %v351_v56  ;;  %402 = vmatpush1.msra.mxu0 %v346_v58  ;;  %v568_v58 = vld [vmem:[#allocation11 + $0xb8] sm:$0xff] }
  0x7d   :  { %959 = vmatpush3.msra.mxu1 %v351_v56  ;;  %403 = vmatprep.subr.mxu0 %v344_v60  ;;  %v567_v56 = vld [vmem:[#allocation11 + $0xb0] sm:$0xff] }
  0x7e   :  { %960 = vmatprep.subr.mxu1 %v348_v59  ;;  %404 = vmatpush1.msra.mxu0 %v343_v61  ;;  %v563_v61 = vld [vmem:[#allocation11 + $0x90] sm:$0xff] }
  0x7f   :  { %961 = vmatpush3.msra.mxu1 %v348_v59  ;;  %405 = vmatprep.subr.mxu0 %v341_v63  ;;  %v564_v59 = vld [vmem:[#allocation11 + $0x98] sm:$0xff]  ;;  %v561_v63 = vld [vmem:[#allocation11 + $0x80] sm:$0xff] }
  0x80   :  { %962 = vmatprep.subr.mxu1 %v345_v62  ;;  %406 = vmatpush1.msra.mxu0 %v340_v0  ;;  %v560_v0 = vld [vmem:[#allocation11 + $0x78] sm:$0xff] }
  0x81   :  { %963 = vmatpush3.msra.mxu1 %v345_v62  ;;  %407 = vmatprep.subr.mxu0 %v338_v2  ;;  %v565_v62 = vld [vmem:[#allocation11 + $0xa0] sm:$0xff]  ;;  %v558_v2 = vld [vmem:[#allocation11 + $0x68] sm:$0xff] }
  0x82   :  { %964 = vmatprep.subr.mxu1 %v342_v1  ;;  %408 = vmatpush1.msra.mxu0 %v337_v3  ;;  %v557_v3 = vld [vmem:[#allocation11 + $0x60] sm:$0xff] }
  0x83   :  { %965 = vmatpush3.msra.mxu1 %v342_v1  ;;  %409 = vmatprep.subr.mxu0 %v335_v5  ;;  %v562_v1 = vld [vmem:[#allocation11 + $0x88] sm:$0xff]  ;;  %v555_v5 = vld [vmem:[#allocation11 + $0x50] sm:$0xff] }
  0x84   :  { %966 = vmatprep.subr.mxu1 %v339_v4  ;;  %410 = vmatpush1.msra.mxu0 %v334_v6  ;;  %v554_v6 = vld [vmem:[#allocation11 + $0x48] sm:$0xff] }
  0x85   :  { %967 = vmatpush3.msra.mxu1 %v339_v4  ;;  %411 = vmatprep.subr.mxu0 %v332_v8  ;;  %v559_v4 = vld [vmem:[#allocation11 + $0x70] sm:$0xff]  ;;  %v552_v8 = vld [vmem:[#allocation11 + $0x38] sm:$0xff] }
  0x86   :  { %968 = vmatprep.subr.mxu1 %v336_v7  ;;  %412 = vmatpush1.msra.mxu0 %v331_v9  ;;  %v551_v9 = vld [vmem:[#allocation11 + $0x30] sm:$0xff] }
  0x87   :  { %969 = vmatpush3.msra.mxu1 %v336_v7  ;;  %413 = vmatprep.subr.mxu0 %v329_v11  ;;  %v556_v7 = vld [vmem:[#allocation11 + $0x58] sm:$0xff]  ;;  %v549_v11 = vld [vmem:[#allocation11 + $0x20] sm:$0xff] }
  0x88   :  { %970 = vmatprep.subr.mxu1 %v333_v10  ;;  %414 = vmatpush1.msra.mxu0 %v328_v12  ;;  %v548_v12 = vld [vmem:[#allocation11 + $0x18] sm:$0xff] }
  0x89   :  { %971 = vmatpush3.msra.mxu1 %v333_v10  ;;  %415 = vmatprep.subr.mxu0 %v326_v14  ;;  %v553_v10 = vld [vmem:[#allocation11 + $0x40] sm:$0xff]  ;;  %v546_v14 = vld [vmem:[#allocation11 + $0x8] sm:$0xff] }
  0x8a   :  { %972 = vmatprep.subr.mxu1 %v330_v13  ;;  %416 = vmatpush1.msra.mxu0 %v325_v15 }
  0x8b   :  { %973 = vmatpush3.msra.mxu1 %v330_v13  ;;  %417 = vmatprep.subr.mxu0 %v323_v17  ;;  %v550_v13 = vld [vmem:[#allocation11 + $0x28] sm:$0xff]  ;;  %v547_v17 = vld [vmem:[#allocation11 + $0x10] sm:$0xff] }
  0x8c   :  { %974 = vmatprep.subr.mxu1 %v327_v16  ;;  %418 = vmatpush1.msra.mxu0 %v322_v18 }
  0x8d   :  { %975 = vmatpush3.msra.mxu1 %v327_v16  ;;  %451 = vmatprep.mubr.f32.mxu0 %v1224_v21  ;;  %v545_v16 = vld [vmem:[#allocation11] sm:$0xff] }
  0x8e   :  { %976 = vmatprep.subr.mxu1 %v324_v19  ;;  %610 = vmatprep.subr.mxu0 %v591_v20 }
  0x8f   :  { %977 = vmatpush3.msra.mxu1 %v324_v19  ;;  %v372_v19 = vlaneseq }
  0x90   :  { %981 = vmatprep.subr.mxu1 %v592_v22 }
  0x91   :  { %v373_v20 = vshrl.u32 %v372_v19, 7 }
 0x12c   :  { %v910_v24 = vpop.f32.mrf.mxu0 }
 0x12d   :  { %v215_v25 = vadd.f32 %v910_v24, %v802_v23  ;;  %v370_v24 = vld [vmem:[%s1340_s7] sm:$0x7]  ;;  %s1225_s7 = smov [#allocation13]  }
 0x12e   :  { %v209_v26 = vpop.f32.mrf.mxu0 }
 0x12f   :  { %v210_v27 = vadd.f32 %v802_v23, %v209_v26  ;;  %v374_v23 = vsub.s32 0, %v373_v20 }
 0x130   :  { %v945_v40 = vpop.f32.mrf.mxu1 }
 0x131   :  { %1028 = vtanh.f32 %v210_v27  ;;  %v315_v60 = vadd.f32 %v945_v40, %v803_v45 }
 0x132   :  { %1030 = vtanh.f32 %v215_v25  ;;  %v309_v48 = vpop.f32.mrf.mxu1  ;;  %v378_v25 = vsub.s32 1, %v373_v20 }
 0x133   :  { %v310_v52 = vadd.f32 %v803_v45, %v309_v48 }
 0x135   :  { %1032 = vtanh.f32 %v310_v52 }
 0x136   :  { %1034 = vtanh.f32 %v315_v60 }
 0x13e   :  { %v1029_v29 = vpop.eup %1028 }
 0x13f   :  { %v1031_v31 = vpop.eup %1030  ;;  %452 = vmatmul.mubr.f32.vlgmr.msra.gmra.mxu0 %v1029_v29  ;;  %978 = vmatprep.mubr.f32.mxu1 %v1029_v29  ;;  %v382_v29 = vsub.s32 2, %v373_v20 }
 0x140   :  { %611 = vmatpush1.msra.mxu0 %v590_v28  ;;  %979 = vmatmul.mubr.f32.vlgmr.msra.gmra.mxu1 %v1031_v31  ;;  %v375_v28 = vrot.slane %v370_v24, %v374_v23 }
 0x141   :  { %612 = vmatprep.subr.mxu0 %v588_v30  ;;  %982 = vmatpush3.msra.mxu1 %v592_v22  ;;  %v379_v30 = vrot.slane %v370_v24, %v378_v25 }
 0x142   :  { %613 = vmatpush1.msra.mxu0 %v587_v32  ;;  %983 = vmatprep.subr.mxu1 %v589_v33  ;;  %v1033_v15 = vpop.eup %1032 }
 0x143   :  { %457 = vmatprep.mubr.f32.mxu0 %v1224_v21  ;;  %614 = vmatprep.subr.mxu0 %v585_v34  ;;  %v1035_v18 = vpop.eup %1034  ;;  %v383_v34 = vrot.slane %v370_v24, %v382_v29 }
 0x144   :  { %984 = vmatpush3.msra.mxu1 %v589_v33  ;;  %458 = vmatmul.mubr.f32.gmra.mxu0 %v1031_v31 }
 0x145   :  { %615 = vmatpush1.msra.mxu0 %v584_v35  ;;  %985 = vmatprep.subr.mxu1 %v586_v36 }
 0x146   :  { %616 = vmatprep.subr.mxu0 %v582_v37  ;;  %986 = vmatpush3.msra.mxu1 %v586_v36 }
 0x147   :  { %617 = vmatpush1.msra.mxu0 %v581_v38  ;;  %987 = vmatprep.subr.mxu1 %v583_v39 }
 0x148   :  { %618 = vmatprep.subr.mxu0 %v579_v41  ;;  %988 = vmatpush3.msra.mxu1 %v583_v39 }
 0x149   :  { %619 = vmatpush1.msra.mxu0 %v578_v42  ;;  %989 = vmatprep.subr.mxu1 %v580_v43 }
 0x14a   :  { %620 = vmatprep.subr.mxu0 %v576_v44  ;;  %990 = vmatpush3.msra.mxu1 %v580_v43 }
 0x14b   :  { %621 = vmatpush1.msra.mxu0 %v575_v46  ;;  %991 = vmatprep.subr.mxu1 %v577_v47 }
 0x14c   :  { %622 = vmatprep.subr.mxu0 %v573_v49  ;;  %992 = vmatpush3.msra.mxu1 %v577_v47 }
 0x14d   :  { %623 = vmatpush1.msra.mxu0 %v572_v50  ;;  %993 = vmatprep.subr.mxu1 %v574_v51 }
 0x14e   :  { %624 = vmatprep.subr.mxu0 %v570_v53  ;;  %994 = vmatpush3.msra.mxu1 %v574_v51 }
 0x14f   :  { %625 = vmatpush1.msra.mxu0 %v569_v54  ;;  %995 = vmatprep.subr.mxu1 %v571_v55 }
 0x150   :  { %626 = vmatprep.subr.mxu0 %v567_v56  ;;  %996 = vmatpush3.msra.mxu1 %v571_v55 }
 0x151   :  { %627 = vmatpush1.msra.mxu0 %v566_v57  ;;  %997 = vmatprep.subr.mxu1 %v568_v58 }
 0x152   :  { %628 = vmatprep.subr.mxu0 %v564_v59  ;;  %998 = vmatpush3.msra.mxu1 %v568_v58 }
 0x153   :  { %629 = vmatpush1.msra.mxu0 %v563_v61  ;;  %999 = vmatprep.subr.mxu1 %v565_v62 }
 0x154   :  { %630 = vmatprep.subr.mxu0 %v561_v63  ;;  %1000 = vmatpush3.msra.mxu1 %v565_v62 }
 0x155   :  { %631 = vmatpush1.msra.mxu0 %v560_v0  ;;  %1001 = vmatprep.subr.mxu1 %v562_v1 }
 0x156   :  { %632 = vmatprep.subr.mxu0 %v558_v2  ;;  %1002 = vmatpush3.msra.mxu1 %v562_v1 }
 0x157   :  { %633 = vmatpush1.msra.mxu0 %v557_v3  ;;  %1003 = vmatprep.subr.mxu1 %v559_v4 }
 0x158   :  { %634 = vmatprep.subr.mxu0 %v555_v5  ;;  %1004 = vmatpush3.msra.mxu1 %v559_v4 }
 0x159   :  { %635 = vmatpush1.msra.mxu0 %v554_v6  ;;  %1005 = vmatprep.subr.mxu1 %v556_v7 }
 0x15a   :  { %636 = vmatprep.subr.mxu0 %v552_v8  ;;  %1006 = vmatpush3.msra.mxu1 %v556_v7 }
 0x15b   :  { %637 = vmatpush1.msra.mxu0 %v551_v9  ;;  %1007 = vmatprep.subr.mxu1 %v553_v10 }
 0x15c   :  { %638 = vmatprep.subr.mxu0 %v549_v11  ;;  %1008 = vmatpush3.msra.mxu1 %v553_v10 }
 0x15d   :  { %639 = vmatpush1.msra.mxu0 %v548_v12  ;;  %1009 = vmatprep.subr.mxu1 %v550_v13 }
 0x15e   :  { %640 = vmatprep.subr.mxu0 %v546_v14  ;;  %1010 = vmatpush3.msra.mxu1 %v550_v13 }
 0x15f   :  { %1013 = vmatprep.mubr.f32.mxu1 %v1033_v15  ;;  %641 = vmatpush1.msra.mxu0 %v545_v16 }
 0x160   :  { %674 = vmatprep.mubr.f32.mxu0 %v1224_v21  ;;  %1011 = vmatprep.subr.mxu1 %v547_v17 }
 0x161   :  { %675 = vmatmul.mubr.f32.vlgmr.msra.gmra.mxu0 %v1033_v15  ;;  %1012 = vmatpush3.msra.mxu1 %v547_v17 }
 0x162   :  { %1014 = vmatmul.mubr.f32.vlgmr.msra.gmra.mxu1 %v1035_v18  ;;  %680 = vmatprep.mubr.f32.mxu0 %v1224_v21  ;;  %v593_v21 = vld [vmem:[%s1342_s9] sm:$0x7]  ;;  %s787_s9 = sshll.u32 %s1225_s7, 4  ;;  %s788_s9 = int_to_ptr.vmem [resolvable:$true] %s787_s9 }
 0x163   :  { %v598_v38 = vrot.slane %v593_v21, %v374_v23  ;;  %v602_v40 = vrot.slane %v593_v21, %v378_v25  ;;  %v606_v43 = vrot.slane %v593_v21, %v382_v29  ;;  %s1184_s1 = scalar_lea.vmem %s788_s9, 256  ;;  %p1189_p3 = scmp.lt.s32.totalorder %s788_s9, %s788_s9 }
 0x164   :  { %p1185_p2 = scmp.ne.s32.totalorder %s788_s9, %s1184_s1  ;;  %p1190_p4 = scmp.lt.s32.totalorder %s1184_s1, %s1184_s1 }
 0x165   :  { %681 = vmatmul.mubr.f32.gmra.mxu0 %v1035_v18 }
 0x166   :  { %p1191_p5 = por %p1190_p4, %p1189_p3 }
 0x168   :  { %p1192_p6 = pnand %p1191_p5, %p1185_p2 }
 0x1ff   :  { %v453_v22 = vpop.f32.mrf.mxu0 }
 0x200   :  { %v980_v27 = vpop.f32.mrf.mxu1  ;;  %v454_v33 = vadd.f32 %v453_v22, %v375_v28 }
 0x201   :  { %v455_v26 = vpop.f32.mrf.mxu0  ;;  %v536_v54 = vadd.f32 %v980_v27, %v383_v34 }
 0x202   :  { %v530_v32 = vpop.f32.mrf.mxu1  ;;  %v456_v35 = vadd.f32 %v455_v26, %v379_v30  ;;  %1036 = vtanh.f32 %v454_v33 }
 0x203   :  { %v531_v36 = vadd.f32 %v530_v32, %v383_v34 }
 0x204   :  { %v459_v31 = vpop.f32.mrf.mxu0  ;;  %1038 = vtanh.f32 %v456_v35 }
 0x205   :  { %v460_v39 = vadd.f32 %v459_v31, %v375_v28  ;;  %1040 = vtanh.f32 %v531_v36 }
 0x206   :  { %v461_v37 = vpop.f32.mrf.mxu0 }
 0x207   :  { %v462_v41 = vadd.f32 %v461_v37, %v379_v30  ;;  %1042 = vtanh.f32 %v460_v39 }
 0x20f   :  { %v1037_v56 = vpop.eup %1036 }
 0x211   :  { %v1039_v57 = vpop.eup %1038 }
 0x212   :  { %v1041_v58 = vpop.eup %1040 }
 0x214   :  { %v1043_v59 = vpop.eup %1042 }
 0x221   :  { %v676_v42 = vpop.f32.mrf.mxu0 }
 0x222   :  { %v677_v44 = vadd.f32 %v676_v42, %v598_v38  ;;  %v1015_v45 = vpop.f32.mrf.mxu1 }
 0x223   :  { %v678_v46 = vpop.f32.mrf.mxu0  ;;  %v759_v49 = vadd.f32 %v1015_v45, %v606_v43 }
 0x224   :  { %1044 = vtanh.f32 %v677_v44  ;;  %v679_v47 = vadd.f32 %v678_v46, %v602_v40  ;;  %v753_v48 = vpop.f32.mrf.mxu1 }
 0x225   :  { %1046 = vtanh.f32 %v462_v41  ;;  %v754_v50 = vadd.f32 %v753_v48, %v606_v43  ;;  %v682_v51 = vpop.f32.mrf.mxu0 }
 0x226   :  { %1048 = vtanh.f32 %v679_v47  ;;  %v683_v52 = vadd.f32 %v682_v51, %v598_v38 }
 0x227   :  { %1050 = vtanh.f32 %v754_v50  ;;  %v684_v53 = vpop.f32.mrf.mxu0 }
 0x228   :  { %1052 = vtanh.f32 %v683_v52  ;;  %v685_v55 = vadd.f32 %v684_v53, %v602_v40 }
 0x229   :  { %1054 = vtanh.f32 %v759_v49 }
 0x22a   :  { %1056 = vtanh.f32 %v685_v55 }
 0x22b   :  { %1058 = vtanh.f32 %v536_v54 }
 0x231   :  { %v1045_v60 = vpop.eup %1044 }
 0x232   :  { %v1047_v61 = vpop.eup %1046  ;;  %v768_v0 = vmul.f32 %v1045_v60, %v1037_v56 }
 0x233   :  { %v1049_v62 = vpop.eup %1048 }
 0x234   :  { %v1051_v63 = vpop.eup %1050  ;;  %v770_v1 = vmul.f32 %v1049_v62, %v1039_v57 }
 0x235   :  { %v1053_v2 = vpop.eup %1052  ;;  %v774_v3 = vmul.f32 %v1051_v63, %v1041_v58 }
 0x236   :  { %v1055_v4 = vpop.eup %1054  ;;  %v772_v5 = vadd.f32 %v770_v1, %v768_v0  ;;  %v769_v8 = vmul.f32 %v1053_v2, %v1043_v59 }
 0x237   :  { %v1057_v6 = vpop.eup %1056 }
 0x238   :  { %v776_v7 = vadd.f32 %v774_v3, %v772_v5  ;;  %v771_v9 = vmul.f32 %v1057_v6, %v1047_v61  ;;  %v1059_v10 = vpop.eup %1058 }
 0x239   :  { %v775_v11 = vmul.f32 %v1059_v10, %v1055_v4 }
 0x23a   :  { %v773_v12 = vadd.f32 %v771_v9, %v769_v8  ;;  %1060 = vtanh.f32 %v776_v7 }
 0x23c   :  { %v777_v13 = vadd.f32 %v775_v11, %v773_v12 }
 0x23e   :  { %1062 = vtanh.f32 %v777_v13 }
 0x247   :  { %v1061_v14 = vpop.eup %1060 }
 0x248   :  { %780 = vst [vmem:[#allocation13] sm:$0xff] %v1061_v14 }
 0x24b   :  { %v1063_v15 = vpop.eup %1062 }
 0x24c   :  { %781 = vst [vmem:[#allocation13 + $0x8] sm:$0xff] %v1063_v15 }
 0x24d   :  { %1195 = shalt.err (!%p1192_p6)
}
 0x24e   :  { %793 = dma.vmem_to_hbm [thread:$0]  %s788_s9, 256, %s1343_s10, [#allocation4], %s1216_s18, %s1216_s18, %s1217_s19  }
 0x24f   :  { %1212 = dma.done.wait [#allocation4], 256  }
 0x250   :  { %1213 = vsyncadd [#allocation4], 4294967040 }
 0x251   :  { %797 = vsyncpa [#allocation3], 1 }
 0x252   :  { %798 = vsyncpa [#allocation6], 1 }
 0x253   :  { %799 = vsyncpa [#allocation9], 1 }
 0x254   :  { %800 = vsyncpa [#allocation12], 1 }
 0x255   :  { %801 = vsyncpa [#allocation4], 1 }

// kernel: tpu_custom_call.1
= control target key start
LH: loop header
LB: loop body
LE: loop exit
PB: predicated region body
PF: predicated region fallthrough
CT: control target
= control target key end

     0   :  { %15 = vsyncpa [#allocation3], 0  ;;  %s1333_s0 = inlined_call_operand.hbm [shape: f32[16,128], index: 0, kind: input, shape index: {}]   ;;  %s1334_s1 = inlined_call_operand.hbm [shape: f32[16,128], index: 1, kind: input, shape index: {}]   ;;  %s1335_s2 = inlined_call_operand.hbm [shape: f32[128,128], index: 2, kind: input, shape index: {}]   ;;  %s1336_s3 = inlined_call_operand.vmem [shape: f32[1,128], index: 3, kind: input, shape index: {}]   ;;  %s1337_s4 = inlined_call_operand.hbm [shape: f32[128,128], index: 4, kind: input, shape index: {}]   ;;  %s1338_s5 = inlined_call_operand.vmem [shape: f32[1,128], index: 5, kind: input, shape index: {}]   ;;  %s1339_s6 = inlined_call_operand.hbm [shape: f32[128,384], index: 6, kind: input, shape index: {}]   ;;  %s1340_s7 = inlined_call_operand.vmem [shape: f32[1,384], index: 7, kind: input, shape index: {}]   ;;  %s1341_s8 = inlined_call_operand.hbm [shape: f32[128,384], index: 8, kind: input, shape index: {}]   ;;  %s1342_s9 = inlined_call_operand.vmem [shape: f32[1,384], index: 9, kind: input, shape index: {}]   ;;  %s1343_s10 = inlined_call_operand.hbm [shape: f32[16,128], index: 10, kind: output, shape index: {}]  }
   0x1   :  { %16 = vsyncpa [#allocation6], 0 }
   0x2   :  { %17 = vsyncpa [#allocation9], 0 }
   0x3   :  { %18 = vsyncpa [#allocation12], 0 }
   0x4   :  { %19 = vsyncpa [#allocation4], 0  ;;  %s1214_s13 = smov [#allocation5]   ;;  %s1215_s15 = smov [#allocation8]  }
   0x5   :  { %s37_s14 = sshll.u32 %s1214_s13, 4  ;;  %s63_s16 = sshll.u32 %s1215_s15, 4  ;;  %s38_s14 = int_to_ptr.vmem [resolvable:$true] %s37_s14  ;;  %s64_s16 = int_to_ptr.vmem [resolvable:$true] %s63_s16 }
   0x6   :  { %s1072_s17 = scalar_lea.vmem %s38_s14, 256  ;;  %p1077_p1 = scmp.lt.s32.totalorder %s38_s14, %s38_s14 }
   0x7   :  { %p1073_p0 = scmp.ne.s32.totalorder %s38_s14, %s1072_s17  ;;  %p1078_p2 = scmp.lt.s32.totalorder %s1072_s17, %s1072_s17 }
   0x9   :  { %p1079_p3 = por %p1078_p2, %p1077_p1 }
   0xb   :  { %p1080_p4 = pnand %p1079_p3, %p1073_p0 }
   0xd   :  { %1083 = shalt.err (!%p1080_p4)
}
   0xe   :  { %s1216_s18 = smov 128   ;;  %s1217_s19 = smov 8  }
   0xf   :  { %43 = dma.hbm_to_vmem [thread:$0]  %s1334_s1, 256, %s38_s14, [#allocation6], %s1216_s18, %s1216_s18, %s1217_s19  }
  0x10   :  { %s1092_s22 = scalar_lea.vmem %s64_s16, 2048  ;;  %p1097_p6 = scmp.lt.s32.totalorder %s64_s16, %s64_s16 }
  0x11   :  { %p1093_p5 = scmp.ne.s32.totalorder %s64_s16, %s1092_s22  ;;  %p1098_p7 = scmp.lt.s32.totalorder %s1092_s22, %s1092_s22 }
  0x13   :  { %p1099_p8 = por %p1098_p7, %p1097_p6 }
  0x15   :  { %p1100_p9 = pnand %p1099_p8, %p1093_p5 }
  0x17   :  { %1103 = shalt.err (!%p1100_p9)
}
  0x18   :  { %69 = dma.hbm_to_vmem [thread:$0]  %s1337_s4, 2048, %s64_s16, [#allocation9], %s1216_s18, %s1216_s18, %s1217_s19  }
  0x19   :  { %s1218_s25 = smov [#allocation2]   ;;  %s1219_s27 = smov [#allocation7]  }
  0x1a   :  { %s25_s26 = sshll.u32 %s1218_s25, 4  ;;  %s49_s28 = sshll.u32 %s1219_s27, 4  ;;  %s26_s26 = int_to_ptr.vmem [resolvable:$true] %s25_s26  ;;  %s50_s28 = int_to_ptr.vmem [resolvable:$true] %s49_s28 }
  0x1b   :  { %s1112_s1 = scalar_lea.vmem %s26_s26, 256  ;;  %p1117_p11 = scmp.lt.s32.totalorder %s26_s26, %s26_s26 }
  0x1c   :  { %p1113_p10 = scmp.ne.s32.totalorder %s26_s26, %s1112_s1  ;;  %p1118_p12 = scmp.lt.s32.totalorder %s1112_s1, %s1112_s1 }
  0x1e   :  { %p1119_p13 = por %p1118_p12, %p1117_p11 }
  0x20   :  { %p1120_p0 = pnand %p1119_p13, %p1113_p10 }
  0x22   :  { %1123 = shalt.err (!%p1120_p0)
}
  0x23   :  { %31 = dma.hbm_to_vmem [thread:$0]  %s1333_s0, 256, %s26_s26, [#allocation3], %s1216_s18, %s1216_s18, %s1217_s19  }
  0x24   :  { %s1132_s4 = scalar_lea.vmem %s50_s28, 2048  ;;  %p1137_p2 = scmp.lt.s32.totalorder %s50_s28, %s50_s28 }
  0x25   :  { %p1133_p1 = scmp.ne.s32.totalorder %s50_s28, %s1132_s4  ;;  %p1138_p3 = scmp.lt.s32.totalorder %s1132_s4, %s1132_s4 }
  0x27   :  { %p1139_p4 = por %p1138_p3, %p1137_p2 }
  0x29   :  { %p1140_p5 = pnand %p1139_p4, %p1133_p1 }
  0x2b   :  { %1143 = shalt.err (!%p1140_p5)
}
  0x2c   :  { %55 = dma.hbm_to_vmem [thread:$0]  %s1335_s2, 2048, %s50_s28, [#allocation6], %s1216_s18, %s1216_s18, %s1217_s19  }
  0x2d   :  { %s1220_s13 = smov [#allocation10]  }
  0x2e   :  { %s77_s14 = sshll.u32 %s1220_s13, 4  ;;  %s78_s14 = int_to_ptr.vmem [resolvable:$true] %s77_s14 }
  0x2f   :  { %s1152_s15 = scalar_lea.vmem %s78_s14, 6144  ;;  %p1157_p7 = scmp.lt.s32.totalorder %s78_s14, %s78_s14 }
  0x30   :  { %p1153_p6 = scmp.ne.s32.totalorder %s78_s14, %s1152_s15  ;;  %p1158_p8 = scmp.lt.s32.totalorder %s1152_s15, %s1152_s15 }
  0x32   :  { %p1159_p9 = por %p1158_p8, %p1157_p7 }
  0x34   :  { %p1160_p10 = pnand %p1159_p9, %p1153_p6 }
  0x36   :  { %1163 = shalt.err (!%p1160_p10)
}
  0x37   :  { %s1221_s0 = smov 384   ;;  %s1222_s16 = smov 24  }
  0x38   :  { %83 = dma.hbm_to_vmem [thread:$0]  %s1339_s6, 6144, %s78_s14, [#allocation9], %s1221_s0, %s1221_s0, %s1222_s16  }
  0x39   :  { %s1223_s21 = smov [#allocation11]  }
  0x3a   :  { %s91_s22 = sshll.u32 %s1223_s21, 4  ;;  %s92_s22 = int_to_ptr.vmem [resolvable:$true] %s91_s22 }
  0x3b   :  { %s1172_s2 = scalar_lea.vmem %s92_s22, 6144  ;;  %p1177_p12 = scmp.lt.s32.totalorder %s92_s22, %s92_s22 }
  0x3c   :  { %p1173_p11 = scmp.ne.s32.totalorder %s92_s22, %s1172_s2  ;;  %p1178_p13 = scmp.lt.s32.totalorder %s1172_s2, %s1172_s2 }
  0x3e   :  { %p1179_p0 = por %p1178_p13, %p1177_p12 }
  0x40   :  { %p1180_p1 = pnand %p1179_p0, %p1173_p11 }
  0x42   :  { %1183 = shalt.err (!%p1180_p1)
}
  0x43   :  { %97 = dma.hbm_to_vmem [thread:$0]  %s1341_s8, 6144, %s92_s22, [#allocation12], %s1221_s0, %s1221_s0, %s1222_s16  }
  0x44   :  { %1204 = dma.done.wait [#allocation3], 256  }
  0x45   :  { %1205 = vsyncadd [#allocation3], 4294967040 }
  0x46   :  { %1206 = dma.done.wait [#allocation6], 2304  }
  0x47   :  { %1207 = vsyncadd [#allocation6], 4294964992 }
  0x48   :  { %1208 = dma.done.wait [#allocation9], 8192  }
  0x49   :  { %1209 = vsyncadd [#allocation9], 4294959104 }
  0x4a   :  { %1210 = dma.done.wait [#allocation12], 6144  }
  0x4b   :  { %1211 = vsyncadd [#allocation12], 4294961152  ;;  %v135_v0 = vld [vmem:[#allocation7 + $0x78] sm:$0xff]  ;;  %v134_v1 = vld [vmem:[#allocation7 + $0x70] sm:$0xff] }
  0x4c   :  { %876 = vmatprep.subr.mxu0 %v135_v0  ;;  %v133_v2 = vld [vmem:[#allocation7 + $0x68] sm:$0xff]  ;;  %v132_v3 = vld [vmem:[#allocation7 + $0x60] sm:$0xff]  ;;  %v235_v4 = vld [vmem:[#allocation8 + $0x78] sm:$0xff] }
  0x4d   :  { %877 = vmatpush3.msra.mxu0 %v135_v0  ;;  %v118_v5 = vld [vmem:[#allocation2] sm:$0xff]  ;;  %v131_v6 = vld [vmem:[#allocation7 + $0x58] sm:$0xff]  ;;  %911 = vmatprep.subr.mxu1 %v235_v4  ;;  %v234_v7 = vld [vmem:[#allocation8 + $0x70] sm:$0xff] }
  0x4e   :  { %878 = vmatprep.subr.mxu0 %v134_v1  ;;  %912 = vmatpush3.msra.mxu1 %v235_v4  ;;  %v130_v8 = vld [vmem:[#allocation7 + $0x50] sm:$0xff]  ;;  %v233_v9 = vld [vmem:[#allocation8 + $0x68] sm:$0xff]  ;;  %v232_v11 = vld [vmem:[#allocation8 + $0x60] sm:$0xff] }
  0x4f   :  { %879 = vmatpush3.msra.mxu0 %v134_v1  ;;  %908 = vmatprep.mubr.f32.mxu0 %v118_v5  ;;  %v129_v10 = vld [vmem:[#allocation7 + $0x48] sm:$0xff]  ;;  %v128_v12 = vld [vmem:[#allocation7 + $0x40] sm:$0xff]  ;;  %v231_v13 = vld [vmem:[#allocation8 + $0x58] sm:$0xff] }
  0x50   :  { %880 = vmatprep.subr.mxu0 %v133_v2  ;;  %913 = vmatprep.subr.mxu1 %v234_v7  ;;  %v127_v14 = vld [vmem:[#allocation7 + $0x38] sm:$0xff]  ;;  %v230_v15 = vld [vmem:[#allocation8 + $0x50] sm:$0xff]  ;;  %v229_v17 = vld [vmem:[#allocation8 + $0x48] sm:$0xff] }
  0x51   :  { %881 = vmatpush3.msra.mxu0 %v133_v2  ;;  %914 = vmatpush3.msra.mxu1 %v234_v7  ;;  %v126_v16 = vld [vmem:[#allocation7 + $0x30] sm:$0xff]  ;;  %v125_v18 = vld [vmem:[#allocation7 + $0x28] sm:$0xff]  ;;  %v228_v19 = vld [vmem:[#allocation8 + $0x40] sm:$0xff] }
  0x52   :  { %882 = vmatprep.subr.mxu0 %v132_v3  ;;  %915 = vmatprep.subr.mxu1 %v233_v9  ;;  %v124_v20 = vld [vmem:[#allocation7 + $0x20] sm:$0xff]  ;;  %v227_v21 = vld [vmem:[#allocation8 + $0x38] sm:$0xff]  ;;  %v226_v23 = vld [vmem:[#allocation8 + $0x30] sm:$0xff] }
  0x53   :  { %883 = vmatpush3.msra.mxu0 %v132_v3  ;;  %916 = vmatpush3.msra.mxu1 %v233_v9  ;;  %v123_v22 = vld [vmem:[#allocation7 + $0x18] sm:$0xff]  ;;  %v122_v24 = vld [vmem:[#allocation7 + $0x10] sm:$0xff]  ;;  %v225_v25 = vld [vmem:[#allocation8 + $0x28] sm:$0xff] }
  0x54   :  { %884 = vmatprep.subr.mxu0 %v131_v6  ;;  %917 = vmatprep.subr.mxu1 %v232_v11  ;;  %v121_v26 = vld [vmem:[#allocation7 + $0x8] sm:$0xff]  ;;  %v224_v27 = vld [vmem:[#allocation8 + $0x20] sm:$0xff]  ;;  %v223_v29 = vld [vmem:[#allocation8 + $0x18] sm:$0xff] }
  0x55   :  { %885 = vmatpush3.msra.mxu0 %v131_v6  ;;  %918 = vmatpush3.msra.mxu1 %v232_v11  ;;  %v120_v28 = vld [vmem:[#allocation7] sm:$0xff]  ;;  %v119_v30 = vld [vmem:[#allocation2 + $0x8] sm:$0xff]  ;;  %v222_v31 = vld [vmem:[#allocation8 + $0x10] sm:$0xff] }
  0x56   :  { %886 = vmatprep.subr.mxu0 %v130_v8  ;;  %919 = vmatprep.subr.mxu1 %v231_v13  ;;  %v218_v32 = vld [vmem:[#allocation5] sm:$0xff]  ;;  %v221_v33 = vld [vmem:[#allocation8 + $0x8] sm:$0xff]  ;;  %v220_v36 = vld [vmem:[#allocation8] sm:$0xff] }
  0x57   :  { %887 = vmatpush3.msra.mxu0 %v130_v8  ;;  %920 = vmatpush3.msra.mxu1 %v231_v13  ;;  %v368_v34 = vld [vmem:[#allocation10 + $0x170] sm:$0xff]  ;;  %v367_v35 = vld [vmem:[#allocation10 + $0x168] sm:$0xff]  ;;  %v365_v37 = vld [vmem:[#allocation10 + $0x158] sm:$0xff] }
  0x58   :  { %888 = vmatprep.subr.mxu0 %v129_v10  ;;  %921 = vmatprep.subr.mxu1 %v230_v15  ;;  %v364_v38 = vld [vmem:[#allocation10 + $0x150] sm:$0xff]  ;;  %v219_v39 = vld [vmem:[#allocation5 + $0x8] sm:$0xff]  ;;  %v362_v41 = vld [vmem:[#allocation10 + $0x140] sm:$0xff] }
  0x59   :  { %889 = vmatpush3.msra.mxu0 %v129_v10  ;;  %922 = vmatpush3.msra.mxu1 %v230_v15  ;;  %v369_v40 = vld [vmem:[#allocation10 + $0x178] sm:$0xff]  ;;  %v366_v42 = vld [vmem:[#allocation10 + $0x160] sm:$0xff]  ;;  %v359_v44 = vld [vmem:[#allocation10 + $0x128] sm:$0xff] }
  0x5a   :  { %890 = vmatprep.subr.mxu0 %v128_v12  ;;  %923 = vmatprep.subr.mxu1 %v229_v17  ;;  %v361_v43 = vld [vmem:[#allocation10 + $0x138] sm:$0xff]  ;;  %v363_v45 = vld [vmem:[#allocation10 + $0x148] sm:$0xff]  ;;  %v358_v46 = vld [vmem:[#allocation10 + $0x120] sm:$0xff] }
  0x5b   :  { %891 = vmatpush3.msra.mxu0 %v128_v12  ;;  %924 = vmatpush3.msra.mxu1 %v229_v17  ;;  %v356_v47 = vld [vmem:[#allocation10 + $0x110] sm:$0xff]  ;;  %v355_v49 = vld [vmem:[#allocation10 + $0x108] sm:$0xff]  ;;  %v353_v50 = vld [vmem:[#allocation10 + $0xf8] sm:$0xff] }
  0x5c   :  { %892 = vmatprep.subr.mxu0 %v127_v14  ;;  %925 = vmatprep.subr.mxu1 %v228_v19  ;;  %v360_v48 = vld [vmem:[#allocation10 + $0x130] sm:$0xff]  ;;  %v357_v51 = vld [vmem:[#allocation10 + $0x118] sm:$0xff]  ;;  %v350_v53 = vld [vmem:[#allocation10 + $0xe0] sm:$0xff] }
  0x5d   :  { %893 = vmatpush3.msra.mxu0 %v127_v14  ;;  %926 = vmatpush3.msra.mxu1 %v228_v19  ;;  %v352_v52 = vld [vmem:[#allocation10 + $0xf0] sm:$0xff]  ;;  %v354_v54 = vld [vmem:[#allocation10 + $0x100] sm:$0xff]  ;;  %v349_v55 = vld [vmem:[#allocation10 + $0xd8] sm:$0xff] }
  0x5e   :  { %894 = vmatprep.subr.mxu0 %v126_v16  ;;  %927 = vmatprep.subr.mxu1 %v227_v21  ;;  %v351_v56 = vld [vmem:[#allocation10 + $0xe8] sm:$0xff]  ;;  %v346_v58 = vld [vmem:[#allocation10 + $0xc0] sm:$0xff]  ;;  %v348_v59 = vld [vmem:[#allocation10 + $0xd0] sm:$0xff] }
  0x5f   :  { %895 = vmatpush3.msra.mxu0 %v126_v16  ;;  %928 = vmatpush3.msra.mxu1 %v227_v21  ;;  %v347_v57 = vld [vmem:[#allocation10 + $0xc8] sm:$0xff]  ;;  %v344_v60 = vld [vmem:[#allocation10 + $0xb0] sm:$0xff]  ;;  %v345_v62 = vld [vmem:[#allocation10 + $0xb8] sm:$0xff]  ;;  %v1224_v21 = vmov 0.0  }
  0x60   :  { %896 = vmatprep.subr.mxu0 %v125_v18  ;;  %929 = vmatprep.subr.mxu1 %v226_v23  ;;  %v343_v61 = vld [vmem:[#allocation10 + $0xa8] sm:$0xff]  ;;  %v341_v63 = vld [vmem:[#allocation10 + $0x98] sm:$0xff]  ;;  %v340_v0 = vld [vmem:[#allocation10 + $0x90] sm:$0xff] }
  0x61   :  { %897 = vmatpush3.msra.mxu0 %v125_v18  ;;  %930 = vmatpush3.msra.mxu1 %v226_v23  ;;  %v342_v1 = vld [vmem:[#allocation10 + $0xa0] sm:$0xff]  ;;  %v337_v3 = vld [vmem:[#allocation10 + $0x78] sm:$0xff]  ;;  %v339_v4 = vld [vmem:[#allocation10 + $0x88] sm:$0xff] }
  0x62   :  { %898 = vmatprep.subr.mxu0 %v124_v20  ;;  %931 = vmatprep.subr.mxu1 %v225_v25  ;;  %v338_v2 = vld [vmem:[#allocation10 + $0x80] sm:$0xff]  ;;  %v335_v5 = vld [vmem:[#allocation10 + $0x68] sm:$0xff]  ;;  %v336_v7 = vld [vmem:[#allocation10 + $0x70] sm:$0xff] }
  0x63   :  { %899 = vmatpush3.msra.mxu0 %v124_v20  ;;  %932 = vmatpush3.msra.mxu1 %v225_v25  ;;  %v334_v6 = vld [vmem:[#allocation10 + $0x60] sm:$0xff]  ;;  %v332_v8 = vld [vmem:[#allocation10 + $0x50] sm:$0xff]  ;;  %v331_v9 = vld [vmem:[#allocation10 + $0x48] sm:$0xff] }
  0x64   :  { %900 = vmatprep.subr.mxu0 %v123_v22  ;;  %933 = vmatprep.subr.mxu1 %v224_v27  ;;  %v333_v10 = vld [vmem:[#allocation10 + $0x58] sm:$0xff]  ;;  %v328_v12 = vld [vmem:[#allocation10 + $0x30] sm:$0xff]  ;;  %v330_v13 = vld [vmem:[#allocation10 + $0x40] sm:$0xff] }
  0x65   :  { %901 = vmatpush3.msra.mxu0 %v123_v22  ;;  %934 = vmatpush3.msra.mxu1 %v224_v27  ;;  %v329_v11 = vld [vmem:[#allocation10 + $0x38] sm:$0xff]  ;;  %v326_v14 = vld [vmem:[#allocation10 + $0x20] sm:$0xff]  ;;  %v327_v16 = vld [vmem:[#allocation10 + $0x28] sm:$0xff] }
  0x66   :  { %902 = vmatprep.subr.mxu0 %v122_v24  ;;  %935 = vmatprep.subr.mxu1 %v223_v29  ;;  %v325_v15 = vld [vmem:[#allocation10 + $0x18] sm:$0xff]  ;;  %v323_v17 = vld [vmem:[#allocation10 + $0x8] sm:$0xff]  ;;  %v322_v18 = vld [vmem:[#allocation10] sm:$0xff] }
  0x67   :  { %903 = vmatpush3.msra.mxu0 %v122_v24  ;;  %936 = vmatpush3.msra.mxu1 %v223_v29  ;;  %v324_v19 = vld [vmem:[#allocation10 + $0x10] sm:$0xff]  ;;  %v592_v22 = vld [vmem:[#allocation11 + $0x178] sm:$0xff]  ;;  %v802_v23 = vld [vmem:[%s1336_s3] ss:$0 sm:$0xff] }
  0x68   :  { %904 = vmatprep.subr.mxu0 %v121_v26  ;;  %937 = vmatprep.subr.mxu1 %v222_v31  ;;  %v591_v20 = vld [vmem:[#allocation11 + $0x170] sm:$0xff] }
  0x69   :  { %905 = vmatpush3.msra.mxu0 %v121_v26  ;;  %938 = vmatpush3.msra.mxu1 %v222_v31 }
  0x6a   :  { %906 = vmatprep.subr.mxu0 %v120_v28  ;;  %943 = vmatprep.mubr.f32.mxu1 %v218_v32  ;;  %v587_v32 = vld [vmem:[#allocation11 + $0x150] sm:$0xff] }
  0x6b   :  { %907 = vmatpush3.msra.mxu0 %v120_v28  ;;  %939 = vmatprep.subr.mxu1 %v221_v33  ;;  %v590_v28 = vld [vmem:[#allocation11 + $0x168] sm:$0xff] }
  0x6c   :  { %909 = vmatmul.mubr.f32.vlgmr.msra.gmra.mxu0 %v119_v30  ;;  %387 = vmatprep.subr.mxu0 %v368_v34  ;;  %v588_v30 = vld [vmem:[#allocation11 + $0x158] sm:$0xff]  ;;  %v585_v34 = vld [vmem:[#allocation11 + $0x140] sm:$0xff] }
  0x6d   :  { %940 = vmatpush3.msra.mxu1 %v221_v33  ;;  %388 = vmatpush1.msra.mxu0 %v367_v35  ;;  %v589_v33 = vld [vmem:[#allocation11 + $0x160] sm:$0xff]  ;;  %v584_v35 = vld [vmem:[#allocation11 + $0x138] sm:$0xff] }
  0x6e   :  { %941 = vmatprep.subr.mxu1 %v220_v36  ;;  %389 = vmatprep.subr.mxu0 %v365_v37  ;;  %v582_v37 = vld [vmem:[#allocation11 + $0x128] sm:$0xff] }
  0x6f   :  { %942 = vmatpush3.msra.mxu1 %v220_v36  ;;  %390 = vmatpush1.msra.mxu0 %v364_v38  ;;  %v586_v36 = vld [vmem:[#allocation11 + $0x148] sm:$0xff]  ;;  %v581_v38 = vld [vmem:[#allocation11 + $0x120] sm:$0xff] }
  0x70   :  { %944 = vmatmul.mubr.f32.vlgmr.msra.gmra.mxu1 %v219_v39  ;;  %946 = vmatprep.subr.mxu1 %v369_v40  ;;  %v583_v39 = vld [vmem:[#allocation11 + $0x130] sm:$0xff] }
  0x71   :  { %947 = vmatpush3.msra.mxu1 %v369_v40  ;;  %391 = vmatprep.subr.mxu0 %v362_v41  ;;  %v579_v41 = vld [vmem:[#allocation11 + $0x110] sm:$0xff] }
  0x72   :  { %948 = vmatprep.subr.mxu1 %v366_v42  ;;  %392 = vmatpush1.msra.mxu0 %v361_v43  ;;  %v580_v43 = vld [vmem:[#allocation11 + $0x118] sm:$0xff] }
  0x73   :  { %949 = vmatpush3.msra.mxu1 %v366_v42  ;;  %393 = vmatprep.subr.mxu0 %v359_v44  ;;  %v578_v42 = vld [vmem:[#allocation11 + $0x108] sm:$0xff]  ;;  %v576_v44 = vld [vmem:[#allocation11 + $0xf8] sm:$0xff] }
  0x74   :  { %950 = vmatprep.subr.mxu1 %v363_v45  ;;  %394 = vmatpush1.msra.mxu0 %v358_v46  ;;  %v575_v46 = vld [vmem:[#allocation11 + $0xf0] sm:$0xff] }
  0x75   :  { %951 = vmatpush3.msra.mxu1 %v363_v45  ;;  %395 = vmatprep.subr.mxu0 %v356_v47  ;;  %v803_v45 = vld [vmem:[%s1338_s5] ss:$0 sm:$0xff] }
  0x76   :  { %952 = vmatprep.subr.mxu1 %v360_v48  ;;  %396 = vmatpush1.msra.mxu0 %v355_v49  ;;  %v577_v47 = vld [vmem:[#allocation11 + $0x100] sm:$0xff] }
  0x77   :  { %953 = vmatpush3.msra.mxu1 %v360_v48  ;;  %397 = vmatprep.subr.mxu0 %v353_v50  ;;  %v573_v49 = vld [vmem:[#allocation11 + $0xe0] sm:$0xff]  ;;  %v572_v50 = vld [vmem:[#allocation11 + $0xd8] sm:$0xff] }
  0x78   :  { %954 = vmatprep.subr.mxu1 %v357_v51  ;;  %398 = vmatpush1.msra.mxu0 %v352_v52 }
  0x79   :  { %955 = vmatpush3.msra.mxu1 %v357_v51  ;;  %399 = vmatprep.subr.mxu0 %v350_v53  ;;  %v574_v51 = vld [vmem:[#allocation11 + $0xe8] sm:$0xff] }
  0x7a   :  { %956 = vmatprep.subr.mxu1 %v354_v54  ;;  %400 = vmatpush1.msra.mxu0 %v349_v55  ;;  %v570_v53 = vld [vmem:[#allocation11 + $0xc8] sm:$0xff]  ;;  %v571_v55 = vld [vmem:[#allocation11 + $0xd0] sm:$0xff] }
  0x7b   :  { %957 = vmatpush3.msra.mxu1 %v354_v54  ;;  %401 = vmatprep.subr.mxu0 %v347_v57  ;;  %v569_v54 = vld [vmem:[#allocation11 + $0xc0] sm:$0xff]  ;;  %v566_v57 = vld [vmem:[#allocation11 + $0xa8] sm:$0xff] }
  0x7c   :  { %958 = vmatprep.subr.mxu1 %v351_v56  ;;  %402 = vmatpush1.msra.mxu0 %v346_v58  ;;  %v568_v58 = vld [vmem:[#allocation11 + $0xb8] sm:$0xff] }
  0x7d   :  { %959 = vmatpush3.msra.mxu1 %v351_v56  ;;  %403 = vmatprep.subr.mxu0 %v344_v60  ;;  %v567_v56 = vld [vmem:[#allocation11 + $0xb0] sm:$0xff] }
  0x7e   :  { %960 = vmatprep.subr.mxu1 %v348_v59  ;;  %404 = vmatpush1.msra.mxu0 %v343_v61  ;;  %v563_v61 = vld [vmem:[#allocation11 + $0x90] sm:$0xff] }
  0x7f   :  { %961 = vmatpush3.msra.mxu1 %v348_v59  ;;  %405 = vmatprep.subr.mxu0 %v341_v63  ;;  %v564_v59 = vld [vmem:[#allocation11 + $0x98] sm:$0xff]  ;;  %v561_v63 = vld [vmem:[#allocation11 + $0x80] sm:$0xff] }
  0x80   :  { %962 = vmatprep.subr.mxu1 %v345_v62  ;;  %406 = vmatpush1.msra.mxu0 %v340_v0  ;;  %v560_v0 = vld [vmem:[#allocation11 + $0x78] sm:$0xff] }
  0x81   :  { %963 = vmatpush3.msra.mxu1 %v345_v62  ;;  %407 = vmatprep.subr.mxu0 %v338_v2  ;;  %v565_v62 = vld [vmem:[#allocation11 + $0xa0] sm:$0xff]  ;;  %v558_v2 = vld [vmem:[#allocation11 + $0x68] sm:$0xff] }
  0x82   :  { %964 = vmatprep.subr.mxu1 %v342_v1  ;;  %408 = vmatpush1.msra.mxu0 %v337_v3  ;;  %v557_v3 = vld [vmem:[#allocation11 + $0x60] sm:$0xff] }
  0x83   :  { %965 = vmatpush3.msra.mxu1 %v342_v1  ;;  %409 = vmatprep.subr.mxu0 %v335_v5  ;;  %v562_v1 = vld [vmem:[#allocation11 + $0x88] sm:$0xff]  ;;  %v555_v5 = vld [vmem:[#allocation11 + $0x50] sm:$0xff] }
  0x84   :  { %966 = vmatprep.subr.mxu1 %v339_v4  ;;  %410 = vmatpush1.msra.mxu0 %v334_v6  ;;  %v554_v6 = vld [vmem:[#allocation11 + $0x48] sm:$0xff] }
  0x85   :  { %967 = vmatpush3.msra.mxu1 %v339_v4  ;;  %411 = vmatprep.subr.mxu0 %v332_v8  ;;  %v559_v4 = vld [vmem:[#allocation11 + $0x70] sm:$0xff]  ;;  %v552_v8 = vld [vmem:[#allocation11 + $0x38] sm:$0xff] }
  0x86   :  { %968 = vmatprep.subr.mxu1 %v336_v7  ;;  %412 = vmatpush1.msra.mxu0 %v331_v9  ;;  %v551_v9 = vld [vmem:[#allocation11 + $0x30] sm:$0xff] }
  0x87   :  { %969 = vmatpush3.msra.mxu1 %v336_v7  ;;  %413 = vmatprep.subr.mxu0 %v329_v11  ;;  %v556_v7 = vld [vmem:[#allocation11 + $0x58] sm:$0xff]  ;;  %v549_v11 = vld [vmem:[#allocation11 + $0x20] sm:$0xff] }
  0x88   :  { %970 = vmatprep.subr.mxu1 %v333_v10  ;;  %414 = vmatpush1.msra.mxu0 %v328_v12  ;;  %v548_v12 = vld [vmem:[#allocation11 + $0x18] sm:$0xff] }
  0x89   :  { %971 = vmatpush3.msra.mxu1 %v333_v10  ;;  %415 = vmatprep.subr.mxu0 %v326_v14  ;;  %v553_v10 = vld [vmem:[#allocation11 + $0x40] sm:$0xff]  ;;  %v546_v14 = vld [vmem:[#allocation11 + $0x8] sm:$0xff] }
  0x8a   :  { %972 = vmatprep.subr.mxu1 %v330_v13  ;;  %416 = vmatpush1.msra.mxu0 %v325_v15 }
  0x8b   :  { %973 = vmatpush3.msra.mxu1 %v330_v13  ;;  %417 = vmatprep.subr.mxu0 %v323_v17  ;;  %v550_v13 = vld [vmem:[#allocation11 + $0x28] sm:$0xff]  ;;  %v547_v17 = vld [vmem:[#allocation11 + $0x10] sm:$0xff] }
  0x8c   :  { %974 = vmatprep.subr.mxu1 %v327_v16  ;;  %418 = vmatpush1.msra.mxu0 %v322_v18 }
  0x8d   :  { %975 = vmatpush3.msra.mxu1 %v327_v16  ;;  %451 = vmatprep.mubr.f32.mxu0 %v1224_v21  ;;  %v545_v16 = vld [vmem:[#allocation11] sm:$0xff] }
  0x8e   :  { %976 = vmatprep.subr.mxu1 %v324_v19  ;;  %610 = vmatprep.subr.mxu0 %v591_v20 }
  0x8f   :  { %977 = vmatpush3.msra.mxu1 %v324_v19  ;;  %v372_v19 = vlaneseq }
  0x90   :  { %981 = vmatprep.subr.mxu1 %v592_v22 }
  0x91   :  { %v373_v20 = vshrl.u32 %v372_v19, 7 }
 0x12c   :  { %v910_v24 = vpop.f32.mrf.mxu0 }
 0x12d   :  { %v215_v25 = vadd.f32 %v910_v24, %v802_v23  ;;  %v370_v24 = vld [vmem:[%s1340_s7] sm:$0x7]  ;;  %s1225_s7 = smov [#allocation13]  }
 0x12e   :  { %v209_v26 = vpop.f32.mrf.mxu0 }
 0x12f   :  { %v210_v27 = vadd.f32 %v802_v23, %v209_v26  ;;  %v374_v23 = vsub.s32 0, %v373_v20 }
 0x130   :  { %v945_v40 = vpop.f32.mrf.mxu1 }
 0x131   :  { %1028 = vtanh.f32 %v210_v27  ;;  %v315_v60 = vadd.f32 %v945_v40, %v803_v45 }
 0x132   :  { %1030 = vtanh.f32 %v215_v25  ;;  %v309_v48 = vpop.f32.mrf.mxu1  ;;  %v378_v25 = vsub.s32 1, %v373_v20 }
 0x133   :  { %v310_v52 = vadd.f32 %v803_v45, %v309_v48 }
 0x135   :  { %1032 = vtanh.f32 %v310_v52 }
 0x136   :  { %1034 = vtanh.f32 %v315_v60 }
 0x13e   :  { %v1029_v29 = vpop.eup %1028 }
 0x13f   :  { %v1031_v31 = vpop.eup %1030  ;;  %452 = vmatmul.mubr.f32.vlgmr.msra.gmra.mxu0 %v1029_v29  ;;  %978 = vmatprep.mubr.f32.mxu1 %v1029_v29  ;;  %v382_v29 = vsub.s32 2, %v373_v20 }
 0x140   :  { %611 = vmatpush1.msra.mxu0 %v590_v28  ;;  %979 = vmatmul.mubr.f32.vlgmr.msra.gmra.mxu1 %v1031_v31  ;;  %v375_v28 = vrot.slane %v370_v24, %v374_v23 }
 0x141   :  { %612 = vmatprep.subr.mxu0 %v588_v30  ;;  %982 = vmatpush3.msra.mxu1 %v592_v22  ;;  %v379_v30 = vrot.slane %v370_v24, %v378_v25 }
 0x142   :  { %613 = vmatpush1.msra.mxu0 %v587_v32  ;;  %983 = vmatprep.subr.mxu1 %v589_v33  ;;  %v1033_v15 = vpop.eup %1032 }
 0x143   :  { %457 = vmatprep.mubr.f32.mxu0 %v1224_v21  ;;  %614 = vmatprep.subr.mxu0 %v585_v34  ;;  %v1035_v18 = vpop.eup %1034  ;;  %v383_v34 = vrot.slane %v370_v24, %v382_v29 }
 0x144   :  { %984 = vmatpush3.msra.mxu1 %v589_v33  ;;  %458 = vmatmul.mubr.f32.gmra.mxu0 %v1031_v31 }
 0x145   :  { %615 = vmatpush1.msra.mxu0 %v584_v35  ;;  %985 = vmatprep.subr.mxu1 %v586_v36 }
 0x146   :  { %616 = vmatprep.subr.mxu0 %v582_v37  ;;  %986 = vmatpush3.msra.mxu1 %v586_v36 }
 0x147   :  { %617 = vmatpush1.msra.mxu0 %v581_v38  ;;  %987 = vmatprep.subr.mxu1 %v583_v39 }
 0x148   :  { %618 = vmatprep.subr.mxu0 %v579_v41  ;;  %988 = vmatpush3.msra.mxu1 %v583_v39 }
 0x149   :  { %619 = vmatpush1.msra.mxu0 %v578_v42  ;;  %989 = vmatprep.subr.mxu1 %v580_v43 }
 0x14a   :  { %620 = vmatprep.subr.mxu0 %v576_v44  ;;  %990 = vmatpush3.msra.mxu1 %v580_v43 }
 0x14b   :  { %621 = vmatpush1.msra.mxu0 %v575_v46  ;;  %991 = vmatprep.subr.mxu1 %v577_v47 }
 0x14c   :  { %622 = vmatprep.subr.mxu0 %v573_v49  ;;  %992 = vmatpush3.msra.mxu1 %v577_v47 }
 0x14d   :  { %623 = vmatpush1.msra.mxu0 %v572_v50  ;;  %993 = vmatprep.subr.mxu1 %v574_v51 }
 0x14e   :  { %624 = vmatprep.subr.mxu0 %v570_v53  ;;  %994 = vmatpush3.msra.mxu1 %v574_v51 }
 0x14f   :  { %625 = vmatpush1.msra.mxu0 %v569_v54  ;;  %995 = vmatprep.subr.mxu1 %v571_v55 }
 0x150   :  { %626 = vmatprep.subr.mxu0 %v567_v56  ;;  %996 = vmatpush3.msra.mxu1 %v571_v55 }
 0x151   :  { %627 = vmatpush1.msra.mxu0 %v566_v57  ;;  %997 = vmatprep.subr.mxu1 %v568_v58 }
 0x152   :  { %628 = vmatprep.subr.mxu0 %v564_v59  ;;  %998 = vmatpush3.msra.mxu1 %v568_v58 }
 0x153   :  { %629 = vmatpush1.msra.mxu0 %v563_v61  ;;  %999 = vmatprep.subr.mxu1 %v565_v62 }
 0x154   :  { %630 = vmatprep.subr.mxu0 %v561_v63  ;;  %1000 = vmatpush3.msra.mxu1 %v565_v62 }
 0x155   :  { %631 = vmatpush1.msra.mxu0 %v560_v0  ;;  %1001 = vmatprep.subr.mxu1 %v562_v1 }
 0x156   :  { %632 = vmatprep.subr.mxu0 %v558_v2  ;;  %1002 = vmatpush3.msra.mxu1 %v562_v1 }
 0x157   :  { %633 = vmatpush1.msra.mxu0 %v557_v3  ;;  %1003 = vmatprep.subr.mxu1 %v559_v4 }
 0x158   :  { %634 = vmatprep.subr.mxu0 %v555_v5  ;;  %1004 = vmatpush3.msra.mxu1 %v559_v4 }
 0x159   :  { %635 = vmatpush1.msra.mxu0 %v554_v6  ;;  %1005 = vmatprep.subr.mxu1 %v556_v7 }
 0x15a   :  { %636 = vmatprep.subr.mxu0 %v552_v8  ;;  %1006 = vmatpush3.msra.mxu1 %v556_v7 }
 0x15b   :  { %637 = vmatpush1.msra.mxu0 %v551_v9  ;;  %1007 = vmatprep.subr.mxu1 %v553_v10 }
 0x15c   :  { %638 = vmatprep.subr.mxu0 %v549_v11  ;;  %1008 = vmatpush3.msra.mxu1 %v553_v10 }
 0x15d   :  { %639 = vmatpush1.msra.mxu0 %v548_v12  ;;  %1009 = vmatprep.subr.mxu1 %v550_v13 }
 0x15e   :  { %640 = vmatprep.subr.mxu0 %v546_v14  ;;  %1010 = vmatpush3.msra.mxu1 %v550_v13 }
 0x15f   :  { %1013 = vmatprep.mubr.f32.mxu1 %v1033_v15  ;;  %641 = vmatpush1.msra.mxu0 %v545_v16 }
 0x160   :  { %674 = vmatprep.mubr.f32.mxu0 %v1224_v21  ;;  %1011 = vmatprep.subr.mxu1 %v547_v17 }
 0x161   :  { %675 = vmatmul.mubr.f32.vlgmr.msra.gmra.mxu0 %v1033_v15  ;;  %1012 = vmatpush3.msra.mxu1 %v547_v17 }
 0x162   :  { %1014 = vmatmul.mubr.f32.vlgmr.msra.gmra.mxu1 %v1035_v18  ;;  %680 = vmatprep.mubr.f32.mxu0 %v1224_v21  ;;  %v593_v21 = vld [vmem:[%s1342_s9] sm:$0x7]  ;;  %s787_s9 = sshll.u32 %s1225_s7, 4  ;;  %s788_s9 = int_to_ptr.vmem [resolvable:$true] %s787_s9 }
 0x163   :  { %v598_v38 = vrot.slane %v593_v21, %v374_v23  ;;  %v602_v40 = vrot.slane %v593_v21, %v378_v25  ;;  %v606_v43 = vrot.slane %v593_v21, %v382_v29  ;;  %s1184_s1 = scalar_lea.vmem %s788_s9, 256  ;;  %p1189_p3 = scmp.lt.s32.totalorder %s788_s9, %s788_s9 }
 0x164   :  { %p1185_p2 = scmp.ne.s32.totalorder %s788_s9, %s1184_s1  ;;  %p1190_p4 = scmp.lt.s32.totalorder %s1184_s1, %s1184_s1 }
 0x165   :  { %681 = vmatmul.mubr.f32.gmra.mxu0 %v1035_v18 }
 0x166   :  { %p1191_p5 = por %p1190_p4, %p1189_p3 }
 0x168   :  { %p1192_p6 = pnand %p1191_p5, %p1185_p2 }
 0x1ff   :  { %v453_v22 = vpop.f32.mrf.mxu0 }
 0x200   :  { %v980_v27 = vpop.f32.mrf.mxu1  ;;  %v454_v33 = vadd.f32 %v453_v22, %v375_v28 }
 0x201   :  { %v455_v26 = vpop.f32.mrf.mxu0  ;;  %v536_v54 = vadd.f32 %v980_v27, %v383_v34 }
 0x202   :  { %v530_v32 = vpop.f32.mrf.mxu1  ;;  %v456_v35 = vadd.f32 %v455_v26, %v379_v30  ;;  %1036 = vtanh.f32 %v454_v33 }
 0x203   :  { %v531_v36 = vadd.f32 %v530_v32, %v383_v34 }
 0x204   :  { %v459_v31 = vpop.f32.mrf.mxu0  ;;  %1038 = vtanh.f32 %v456_v35 }
 0x205   :  { %v460_v39 = vadd.f32 %v459_v31, %v375_v28  ;;  %1040 = vtanh.f32 %v531_v36 }
 0x206   :  { %v461_v37 = vpop.f32.mrf.mxu0 }
 0x207   :  { %v462_v41 = vadd.f32 %v461_v37, %v379_v30  ;;  %1042 = vtanh.f32 %v460_v39 }
 0x20f   :  { %v1037_v56 = vpop.eup %1036 }
 0x211   :  { %v1039_v57 = vpop.eup %1038 }
 0x212   :  { %v1041_v58 = vpop.eup %1040 }
 0x214   :  { %v1043_v59 = vpop.eup %1042 }
 0x221   :  { %v676_v42 = vpop.f32.mrf.mxu0 }
 0x222   :  { %v677_v44 = vadd.f32 %v676_v42, %v598_v38  ;;  %v1015_v45 = vpop.f32.mrf.mxu1 }
 0x223   :  { %v678_v46 = vpop.f32.mrf.mxu0  ;;  %v759_v49 = vadd.f32 %v1015_v45, %v606_v43 }
 0x224   :  { %1044 = vtanh.f32 %v677_v44  ;;  %v679_v47 = vadd.f32 %v678_v46, %v602_v40  ;;  %v753_v48 = vpop.f32.mrf.mxu1 }
 0x225   :  { %1046 = vtanh.f32 %v462_v41  ;;  %v754_v50 = vadd.f32 %v753_v48, %v606_v43  ;;  %v682_v51 = vpop.f32.mrf.mxu0 }
 0x226   :  { %1048 = vtanh.f32 %v679_v47  ;;  %v683_v52 = vadd.f32 %v682_v51, %v598_v38 }
 0x227   :  { %1050 = vtanh.f32 %v754_v50  ;;  %v684_v53 = vpop.f32.mrf.mxu0 }
 0x228   :  { %1052 = vtanh.f32 %v683_v52  ;;  %v685_v55 = vadd.f32 %v684_v53, %v602_v40 }
 0x229   :  { %1054 = vtanh.f32 %v759_v49 }
 0x22a   :  { %1056 = vtanh.f32 %v685_v55 }
 0x22b   :  { %1058 = vtanh.f32 %v536_v54 }
 0x231   :  { %v1045_v60 = vpop.eup %1044 }
 0x232   :  { %v1047_v61 = vpop.eup %1046  ;;  %v768_v0 = vmul.f32 %v1045_v60, %v1037_v56 }
 0x233   :  { %v1049_v62 = vpop.eup %1048 }
 0x234   :  { %v1051_v63 = vpop.eup %1050  ;;  %v770_v1 = vmul.f32 %v1049_v62, %v1039_v57 }
 0x235   :  { %v1053_v2 = vpop.eup %1052  ;;  %v774_v3 = vmul.f32 %v1051_v63, %v1041_v58 }
 0x236   :  { %v1055_v4 = vpop.eup %1054  ;;  %v772_v5 = vadd.f32 %v770_v1, %v768_v0  ;;  %v769_v8 = vmul.f32 %v1053_v2, %v1043_v59 }
 0x237   :  { %v1057_v6 = vpop.eup %1056 }
 0x238   :  { %v776_v7 = vadd.f32 %v774_v3, %v772_v5  ;;  %v771_v9 = vmul.f32 %v1057_v6, %v1047_v61  ;;  %v1059_v10 = vpop.eup %1058 }
 0x239   :  { %v775_v11 = vmul.f32 %v1059_v10, %v1055_v4 }
 0x23a   :  { %v773_v12 = vadd.f32 %v771_v9, %v769_v8  ;;  %1060 = vtanh.f32 %v776_v7 }
 0x23c   :  { %v777_v13 = vadd.f32 %v775_v11, %v773_v12 }
 0x23e   :  { %1062 = vtanh.f32 %v777_v13 }
 0x247   :  { %v1061_v14 = vpop.eup %1060 }
 0x248   :  { %780 = vst [vmem:[#allocation13] sm:$0xff] %v1061_v14 }
 0x24b   :  { %v1063_v15 = vpop.eup %1062 }
 0x24c   :  { %781 = vst [vmem:[#allocation13 + $0x8] sm:$0xff] %v1063_v15 }
 0x24d   :  { %1195 = shalt.err (!%p1192_p6)
}
 0x24e   :  { %793 = dma.vmem_to_hbm [thread:$0]  %s788_s9, 256, %s1343_s10, [#allocation4], %s1216_s18, %s1216_s18, %s1217_s19  }
 0x24f   :  { %1212 = dma.done.wait [#allocation4], 256  }
 0x250   :  { %1213 = vsyncadd [#allocation4], 4294967040 }
 0x251   :  { %797 = vsyncpa [#allocation3], 1 }
 0x252   :  { %798 = vsyncpa [#allocation6], 1 }
 0x253   :  { %799 = vsyncpa [#allocation9], 1 }
 0x254   :  { %800 = vsyncpa [#allocation12], 1 }
 0x255   :  { %801 = vsyncpa [#allocation4], 1 }

</bundles_post_ra>
